<compile_context>
chip_gen: v6e
topology: v6e:2x2x1
jax: 0.10.0
libtpu: 0.0.40
codegen_flags: <defaults>
</compile_context>

<pallas_src>
import numpy as np
import jax
import jax.numpy as jnp
from jax import lax
from jax.experimental import pallas as pl
from jax.experimental.pallas import tpu as pltpu


# ------------------------------ fused kernel ---------------------------------
def _make_kernel(n_layer, n_head, d, hidden_dim, N, Sp, TB):
    dp1 = d + 1
    D = dp1 + hidden_dim
    S = N + 1
    inv_n = 1.0 / float(N)
    f32 = jnp.float32

    def kernel(zin_ref, qmask_ref, w1_ref, b1_ref, w2_ref, b2_ref,
               w3_ref, b3_ref, q_ref, pt_ref, o_ref, z_scr):
        # ---- token-wise MLP embedding on the whole (TB*Sp, d+1) slab ----
        zin = zin_ref[...].astype(f32)                                  # (TB*Sp, d+1)
        h = jnp.dot(zin, w1_ref[...], preferred_element_type=f32) + b1_ref[...]
        h = jnp.maximum(h, 0.0)
        h = jnp.dot(h, w2_ref[...], preferred_element_type=f32) + b2_ref[...]
        h = jnp.maximum(h, 0.0)
        emb = jnp.dot(h, w3_ref[...], preferred_element_type=f32) + b3_ref[...]   # (TB*Sp, hidden)

        # query row of each sample gets the constant "ones" placeholder embedding
        qm = qmask_ref[...]                                             # (TB*Sp, 1) in {0,1}
        emb = emb * (1.0 - qm) + qm

        # ---- Z = [Z_in | emb]: two masked lane stores into VMEM (D < 128, one tile) ----
        z_scr[:, :dp1] = zin
        z_scr[:, dp1:] = emb
        z_all = z_scr[...]                                              # (TB*Sp, D)

        # ---- per-sample linear attention, Gram-matrix form ----
        for b in range(TB):
            zb = z_all[b * Sp:b * Sp + S, :]                            # (S, D), tile-aligned start
            for l in range(n_layer):
                zk = zb[:N, :]                                          # first-N keys == Attn @ A masking
                gram = lax.dot_general(zk, zk, (((0,), (0,)), ((), ())),
                                       preferred_element_type=f32)     # (D, D) = Zk^T Zk
                mix = jnp.zeros((D, D), f32)
                for hh in range(n_head):                                # full (D,D) blocks, no lane slicing
                    qg = jnp.dot(q_ref[l, hh], gram, preferred_element_type=f32)
                    mix = mix + jnp.dot(qg, pt_ref[l, hh], preferred_element_type=f32)
                zb = zb + jnp.dot(zb, mix, preferred_element_type=f32) * inv_n
            o_ref[b] = zb.astype(o_ref.dtype)

    return kernel


# ------------------------------- full forward --------------------------------
def transformer_forward(Z_in, params, *, block_b=None):
    B, S, dp1 = Z_in.shape
    d = dp1 - 1
    N = S - 1
    hidden = params['w3'].shape[1]
    D = dp1 + hidden
    allparam = params['allparam']                                       # (L, H, 2, D, D)
    n_layer, n_head = allparam.shape[0], allparam.shape[1]

    # Rows per grid step: amortize per-step overhead, but keep >= 2 grid steps
    # when possible so v7x can split across both TensorCores.
    if block_b is None:
        block_b = B // 2 if (B >= 2 and B % 2 == 0) else B
    assert B % block_b == 0, "block_b must divide B"
    grid_b = B // block_b

    # Pad sequence to a sublane-tile multiple so the flattened token slab keeps
    # legal, tile-aligned block shapes (padded rows are computed but never read).
    Sp = ((S + 7) // 8) * 8
    Zp = Z_in if Sp == S else jnp.pad(Z_in, ((0, 0), (0, Sp - S), (0, 0)))
    Zf = Zp.reshape(B * Sp, dp1)
    R = block_b * Sp

    # 0/1 selector for each sample's query row (replaces in-kernel iota/where).
    qmask = jnp.tile((jnp.arange(Sp) == N).astype(jnp.float32), block_b).reshape(R, 1)

    # Per-head attention weights as (L, H, D, D): Q and P^T, indexed whole in-kernel.
    Qw = allparam[:, :, 1]
    Pt = jnp.swapaxes(allparam[:, :, 0], -1, -2)

    w1, b1 = params['w1'], params['b1'].reshape(1, -1)
    w2, b2 = params['w2'], params['b2'].reshape(1, -1)
    w3, b3 = params['w3'], params['b3'].reshape(1, -1)

    kernel = _make_kernel(n_layer, n_head, d, hidden, N, Sp, block_b)

    def const_spec(arr):
        nd = arr.ndim
        return pl.BlockSpec(arr.shape, lambda i, _n=nd: (0,) * _n)

    out = pl.pallas_call(
        kernel,
        out_shape=jax.ShapeDtypeStruct((B, S, D), Z_in.dtype),
        grid=(grid_b,),
        in_specs=[
            pl.BlockSpec((R, dp1), lambda i: (i, 0)),                   # TB samples' tokens per step
            const_spec(qmask),
            const_spec(w1), const_spec(b1),
            const_spec(w2), const_spec(b2),
            const_spec(w3), const_spec(b3),
            const_spec(Qw), const_spec(Pt),
        ],
        out_specs=pl.BlockSpec((block_b, S, D), lambda i: (i, 0, 0)),
        scratch_shapes=[pltpu.VMEM((R, D), jnp.float32)],
        compiler_params=pltpu.CompilerParams(
            dimension_semantics=("parallel",)),
    )(Zf, qmask, w1, b1, w2, b2, w3, b3, Qw, Pt)
    return out


# ------------------------------ pure-JAX reference ---------------------------
def _reference_forward(Z_in, params):
    with jax.default_matmul_precision("float32"):
        B, S, dp1 = Z_in.shape
        hidden = params['w3'].shape[1]
        x = Z_in[:, :-1, :]
        h = jnp.maximum(x @ params['w1'] + params['b1'], 0.0)
        h = jnp.maximum(h @ params['w2'] + params['b2'], 0.0)
        emb = h @ params['w3'] + params['b3']
        emb = jnp.concatenate([emb, jnp.ones((B, 1, hidden), Z_in.dtype)], axis=1)
        Z = jnp.concatenate([Z_in, emb], axis=2)
        N = S - 1
        A = jnp.eye(S).at[N, N].set(0.0)
        allparam = params['allparam']
        for i in range(allparam.shape[0]):
            Zi = Z
            res = 0.0
            for j in range(allparam.shape[1]):
                P = allparam[i, j, 0]
                Q = allparam[i, j, 1]
                attn = jnp.einsum('BNi,ij,BMj->BNM', Zi, Q, Zi)
                key = jnp.einsum('ij,BNj->BNi', P, Zi)
                out = jnp.einsum('BNM,ML,BLi->BNi', attn, A, key)
                res = res + out / N
            Z = Zi + res
        return Z


# ----------------------------------- main -------------------------------------
if __name__ == "__main__":
    # Module hyperparameters (small, consistent with the PyTorch __init__)
    n_layer, n_head = 2, 2
    d, hidden_dim = 4, 8
    var = 0.1
    B, N = 8, 8                    # B=8 -> 2 grid steps of 4 samples each
    S = N + 1                      # tokens (last token is the query row)
    D = d + 1 + hidden_dim         # feature dim after embedding concat
    h3 = hidden_dim * 3

    key = jax.random.PRNGKey(0)
    ks = jax.random.split(key, 8)

    params = {
        'allparam': var * jax.random.normal(ks[0], (n_layer, n_head, 2, D, D), jnp.float32),
        'w1': 0.1 * jax.random.normal(ks[1], (d + 1, h3), jnp.float32),
        'b1': 0.1 * jax.random.normal(ks[2], (h3,), jnp.float32),
        'w2': 0.1 * jax.random.normal(ks[3], (h3, h3), jnp.float32),
        'b2': 0.1 * jax.random.normal(ks[4], (h3,), jnp.float32),
        'w3': 0.1 * jax.random.normal(ks[5], (h3, hidden_dim), jnp.float32),
        'b3': 0.1 * jax.random.normal(ks[6], (hidden_dim,), jnp.float32),
    }
    Z_in = jax.random.normal(ks[7], (B, S, d + 1), jnp.float32)

    fwd = jax.jit(transformer_forward)
    out = jax.block_until_ready(fwd(Z_in, params))

    ref = jax.block_until_ready(_reference_forward(Z_in, params))
    np.testing.assert_allclose(np.asarray(out), np.asarray(ref), rtol=1e-4, atol=1e-4)

    print("KERNEL_OK")
</pallas_src>

<mosaic_0001>
module attributes {stable_mosaic.version = 11 : i64} {
  func.func @kernel(%arg0: i32, %arg1: memref<64x5xf32, #tpu.memory_space<vmem>>, %arg2: memref<64x1xf32, #tpu.memory_space<vmem>>, %arg3: memref<5x24xf32, #tpu.memory_space<vmem>>, %arg4: memref<1x24xf32, #tpu.memory_space<vmem>>, %arg5: memref<24x24xf32, #tpu.memory_space<vmem>>, %arg6: memref<1x24xf32, #tpu.memory_space<vmem>>, %arg7: memref<24x8xf32, #tpu.memory_space<vmem>>, %arg8: memref<1x8xf32, #tpu.memory_space<vmem>>, %arg9: memref<2x2x13x13xf32, #tpu.memory_space<vmem>>, %arg10: memref<2x2x13x13xf32, #tpu.memory_space<vmem>>, %arg11: memref<4x9x13xf32, #tpu.memory_space<vmem>>, %arg12: memref<64x13xf32, #tpu.memory_space<vmem>>) attributes {dimension_semantics = [#tpu.dimension_semantics<parallel>], iteration_bounds = array<i64: 2>, scalar_prefetch = 0 : i64, scratch_operands = 1 : i64, tpu.core_type = #tpu.core_type<tc>, window_params = [{transform_indices = @transform_0, window_bounds = array<i64: 64, 5>}, {pipeline_mode = #tpu.pipeline_mode<synchronous>, transform_indices = @transform_1, window_bounds = array<i64: 64, 1>}, {pipeline_mode = #tpu.pipeline_mode<synchronous>, transform_indices = @transform_2, window_bounds = array<i64: 5, 24>}, {pipeline_mode = #tpu.pipeline_mode<synchronous>, transform_indices = @transform_3, window_bounds = array<i64: 1, 24>}, {pipeline_mode = #tpu.pipeline_mode<synchronous>, transform_indices = @transform_4, window_bounds = array<i64: 24, 24>}, {pipeline_mode = #tpu.pipeline_mode<synchronous>, transform_indices = @transform_5, window_bounds = array<i64: 1, 24>}, {pipeline_mode = #tpu.pipeline_mode<synchronous>, transform_indices = @transform_6, window_bounds = array<i64: 24, 8>}, {pipeline_mode = #tpu.pipeline_mode<synchronous>, transform_indices = @transform_7, window_bounds = array<i64: 1, 8>}, {pipeline_mode = #tpu.pipeline_mode<synchronous>, transform_indices = @transform_8, window_bounds = array<i64: 2, 2, 13, 13>}, {pipeline_mode = #tpu.pipeline_mode<synchronous>, transform_indices = @transform_9, window_bounds = array<i64: 2, 2, 13, 13>}, {transform_indices = @transform_10, window_bounds = array<i64: 4, 9, 13>}]} {
    %c0 = arith.constant 0 : index
    %c0_0 = arith.constant 0 : index
    %0 = vector.load %arg1[%c0, %c0_0] : memref<64x5xf32, #tpu.memory_space<vmem>>, vector<64x5xf32>
    %c0_1 = arith.constant 0 : index
    %c0_2 = arith.constant 0 : index
    %1 = vector.load %arg3[%c0_1, %c0_2] : memref<5x24xf32, #tpu.memory_space<vmem>>, vector<5x24xf32>
    %cst = arith.constant dense<0.000000e+00> : vector<64x24xf32>
    %2 = tpu.matmul %0, %1, %cst {dimension_numbers = #tpu.dot_dimension_numbers<[1], [0], [0], [1], [0, 0, 1, 1], [], []>} : vector<64x5xf32>, vector<5x24xf32>, vector<64x24xf32> -> vector<64x24xf32>
    %c0_3 = arith.constant 0 : index
    %c0_4 = arith.constant 0 : index
    %3 = vector.load %arg4[%c0_3, %c0_4] : memref<1x24xf32, #tpu.memory_space<vmem>>, vector<1x24xf32>
    %4 = vector.broadcast %3 : vector<1x24xf32> to vector<64x24xf32>
    %5 = arith.addf %2, %4 : vector<64x24xf32>
    %cst_5 = arith.constant 0.000000e+00 : f32
    %6 = vector.broadcast %cst_5 : f32 to vector<64x24xf32>
    %7 = arith.maximumf %5, %6 : vector<64x24xf32>
    %c0_6 = arith.constant 0 : index
    %c0_7 = arith.constant 0 : index
    %8 = vector.load %arg5[%c0_6, %c0_7] : memref<24x24xf32, #tpu.memory_space<vmem>>, vector<24x24xf32>
    %cst_8 = arith.constant dense<0.000000e+00> : vector<64x24xf32>
    %9 = tpu.matmul %7, %8, %cst_8 {dimension_numbers = #tpu.dot_dimension_numbers<[1], [0], [0], [1], [0, 0, 1, 1], [], []>} : vector<64x24xf32>, vector<24x24xf32>, vector<64x24xf32> -> vector<64x24xf32>
    %c0_9 = arith.constant 0 : index
    %c0_10 = arith.constant 0 : index
    %10 = vector.load %arg6[%c0_9, %c0_10] : memref<1x24xf32, #tpu.memory_space<vmem>>, vector<1x24xf32>
    %11 = vector.broadcast %10 : vector<1x24xf32> to vector<64x24xf32>
    %12 = arith.addf %9, %11 : vector<64x24xf32>
    %cst_11 = arith.constant 0.000000e+00 : f32
    %13 = vector.broadcast %cst_11 : f32 to vector<64x24xf32>
    %14 = arith.maximumf %12, %13 : vector<64x24xf32>
    %c0_12 = arith.constant 0 : index
    %c0_13 = arith.constant 0 : index
    %15 = vector.load %arg7[%c0_12, %c0_13] : memref<24x8xf32, #tpu.memory_space<vmem>>, vector<24x8xf32>
    %cst_14 = arith.constant dense<0.000000e+00> : vector<64x8xf32>
    %16 = tpu.matmul %14, %15, %cst_14 {dimension_numbers = #tpu.dot_dimension_numbers<[1], [0], [0], [1], [0, 0, 1, 1], [], []>} : vector<64x24xf32>, vector<24x8xf32>, vector<64x8xf32> -> vector<64x8xf32>
    %c0_15 = arith.constant 0 : index
    %c0_16 = arith.constant 0 : index
    %17 = vector.load %arg8[%c0_15, %c0_16] : memref<1x8xf32, #tpu.memory_space<vmem>>, vector<1x8xf32>
    %18 = vector.broadcast %17 : vector<1x8xf32> to vector<64x8xf32>
    %19 = arith.addf %16, %18 : vector<64x8xf32>
    %c0_17 = arith.constant 0 : index
    %c0_18 = arith.constant 0 : index
    %20 = vector.load %arg2[%c0_17, %c0_18] : memref<64x1xf32, #tpu.memory_space<vmem>>, vector<64x1xf32>
    %cst_19 = arith.constant 1.000000e+00 : f32
    %21 = vector.broadcast %cst_19 : f32 to vector<64x1xf32>
    %22 = arith.subf %21, %20 : vector<64x1xf32>
    %23 = vector.broadcast %22 : vector<64x1xf32> to vector<64x8xf32>
    %24 = arith.mulf %19, %23 : vector<64x8xf32>
    %25 = vector.broadcast %20 : vector<64x1xf32> to vector<64x8xf32>
    %26 = arith.addf %24, %25 : vector<64x8xf32>
    %c0_20 = arith.constant 0 : index
    %c0_21 = arith.constant 0 : index
    %27 = vector.load %arg12[%c0_20, %c0_21] : memref<64x13xf32, #tpu.memory_space<vmem>>, vector<64x5xf32>
    tpu.vector_store %arg12[%c0_20, %c0_21], %0 {strides = array<i32>} : memref<64x13xf32, #tpu.memory_space<vmem>>, vector<64x5xf32>,
    %c0_22 = arith.constant 0 : index
    %c5 = arith.constant 5 : index
    %28 = vector.load %arg12[%c0_22, %c5] : memref<64x13xf32, #tpu.memory_space<vmem>>, vector<64x8xf32>
    tpu.vector_store %arg12[%c0_22, %c5], %26 {strides = array<i32>} : memref<64x13xf32, #tpu.memory_space<vmem>>, vector<64x8xf32>,
    %c0_23 = arith.constant 0 : index
    %c0_24 = arith.constant 0 : index
    %29 = vector.load %arg12[%c0_23, %c0_24] : memref<64x13xf32, #tpu.memory_space<vmem>>, vector<64x13xf32>
    %30 = vector.extract_strided_slice %29 {offsets = [0, 0], sizes = [9, 13], strides = [1, 1]} : vector<64x13xf32> to vector<9x13xf32>
    %31 = vector.extract_strided_slice %30 {offsets = [0, 0], sizes = [8, 13], strides = [1, 1]} : vector<9x13xf32> to vector<8x13xf32>
    %cst_25 = arith.constant dense<0.000000e+00> : vector<13x13xf32>
    %32 = tpu.matmul %31, %31, %cst_25 {dimension_numbers = #tpu.dot_dimension_numbers<[0], [0], [1], [1], [0, 1, 1, 1], [], []>} : vector<8x13xf32>, vector<8x13xf32>, vector<13x13xf32> -> vector<13x13xf32>
    %cst_26 = arith.constant 0.000000e+00 : f32
    %33 = vector.broadcast %cst_26 : f32 to vector<13x13xf32>
    %c0_27 = arith.constant 0 : index
    %c0_28 = arith.constant 0 : index
    %c0_29 = arith.constant 0 : index
    %c0_30 = arith.constant 0 : index
    %34 = vector.load %arg9[%c0_27, %c0_28, %c0_29, %c0_30] : memref<2x2x13x13xf32, #tpu.memory_space<vmem>>, vector<1x1x13x13xf32>
    %35 = vector.shape_cast %34 : vector<1x1x13x13xf32> to vector<13x13xf32>
    %cst_31 = arith.constant dense<0.000000e+00> : vector<13x13xf32>
    %36 = tpu.matmul %35, %32, %cst_31 {dimension_numbers = #tpu.dot_dimension_numbers<[1], [0], [0], [1], [0, 0, 1, 1], [], []>} : vector<13x13xf32>, vector<13x13xf32>, vector<13x13xf32> -> vector<13x13xf32>
    %c0_32 = arith.constant 0 : index
    %c0_33 = arith.constant 0 : index
    %c0_34 = arith.constant 0 : index
    %c0_35 = arith.constant 0 : index
    %37 = vector.load %arg10[%c0_32, %c0_33, %c0_34, %c0_35] : memref<2x2x13x13xf32, #tpu.memory_space<vmem>>, vector<1x1x13x13xf32>
    %38 = vector.shape_cast %37 : vector<1x1x13x13xf32> to vector<13x13xf32>
    %cst_36 = arith.constant dense<0.000000e+00> : vector<13x13xf32>
    %39 = tpu.matmul %36, %38, %cst_36 {dimension_numbers = #tpu.dot_dimension_numbers<[1], [0], [0], [1], [0, 0, 1, 1], [], []>} : vector<13x13xf32>, vector<13x13xf32>, vector<13x13xf32> -> vector<13x13xf32>
    %40 = arith.addf %33, %39 : vector<13x13xf32>
    %c0_37 = arith.constant 0 : index
    %c1 = arith.constant 1 : index
    %c0_38 = arith.constant 0 : index
    %c0_39 = arith.constant 0 : index
    %41 = vector.load %arg9[%c0_37, %c1, %c0_38, %c0_39] : memref<2x2x13x13xf32, #tpu.memory_space<vmem>>, vector<1x1x13x13xf32>
    %42 = vector.shape_cast %41 : vector<1x1x13x13xf32> to vector<13x13xf32>
    %cst_40 = arith.constant dense<0.000000e+00> : vector<13x13xf32>
    %43 = tpu.matmul %42, %32, %cst_40 {dimension_numbers = #tpu.dot_dimension_numbers<[1], [0], [0], [1], [0, 0, 1, 1], [], []>} : vector<13x13xf32>, vector<13x13xf32>, vector<13x13xf32> -> vector<13x13xf32>
    %c0_41 = arith.constant 0 : index
    %c1_42 = arith.constant 1 : index
    %c0_43 = arith.constant 0 : index
    %c0_44 = arith.constant 0 : index
    %44 = vector.load %arg10[%c0_41, %c1_42, %c0_43, %c0_44] : memref<2x2x13x13xf32, #tpu.memory_space<vmem>>, vector<1x1x13x13xf32>
    %45 = vector.shape_cast %44 : vector<1x1x13x13xf32> to vector<13x13xf32>
    %cst_45 = arith.constant dense<0.000000e+00> : vector<13x13xf32>
    %46 = tpu.matmul %43, %45, %cst_45 {dimension_numbers = #tpu.dot_dimension_numbers<[1], [0], [0], [1], [0, 0, 1, 1], [], []>} : vector<13x13xf32>, vector<13x13xf32>, vector<13x13xf32> -> vector<13x13xf32>
    %47 = arith.addf %40, %46 : vector<13x13xf32>
    %cst_46 = arith.constant dense<0.000000e+00> : vector<9x13xf32>
    %48 = tpu.matmul %30, %47, %cst_46 {dimension_numbers = #tpu.dot_dimension_numbers<[1], [0], [0], [1], [0, 0, 1, 1], [], []>} : vector<9x13xf32>, vector<13x13xf32>, vector<9x13xf32> -> vector<9x13xf32>
    %cst_47 = arith.constant 1.250000e-01 : f32
    %49 = vector.broadcast %cst_47 : f32 to vector<9x13xf32>
    %50 = arith.mulf %48, %49 : vector<9x13xf32>
    %51 = arith.addf %30, %50 : vector<9x13xf32>
    %52 = vector.extract_strided_slice %51 {offsets = [0, 0], sizes = [8, 13], strides = [1, 1]} : vector<9x13xf32> to vector<8x13xf32>
    %cst_48 = arith.constant dense<0.000000e+00> : vector<13x13xf32>
    %53 = tpu.matmul %52, %52, %cst_48 {dimension_numbers = #tpu.dot_dimension_numbers<[0], [0], [1], [1], [0, 1, 1, 1], [], []>} : vector<8x13xf32>, vector<8x13xf32>, vector<13x13xf32> -> vector<13x13xf32>
    %cst_49 = arith.constant 0.000000e+00 : f32
    %54 = vector.broadcast %cst_49 : f32 to vector<13x13xf32>
    %c1_50 = arith.constant 1 : index
    %c0_51 = arith.constant 0 : index
    %c0_52 = arith.constant 0 : index
    %c0_53 = arith.constant 0 : index
    %55 = vector.load %arg9[%c1_50, %c0_51, %c0_52, %c0_53] : memref<2x2x13x13xf32, #tpu.memory_space<vmem>>, vector<1x1x13x13xf32>
    %56 = vector.shape_cast %55 : vector<1x1x13x13xf32> to vector<13x13xf32>
    %cst_54 = arith.constant dense<0.000000e+00> : vector<13x13xf32>
    %57 = tpu.matmul %56, %53, %cst_54 {dimension_numbers = #tpu.dot_dimension_numbers<[1], [0], [0], [1], [0, 0, 1, 1], [], []>} : vector<13x13xf32>, vector<13x13xf32>, vector<13x13xf32> -> vector<13x13xf32>
    %c1_55 = arith.constant 1 : index
    %c0_56 = arith.constant 0 : index
    %c0_57 = arith.constant 0 : index
    %c0_58 = arith.constant 0 : index
    %58 = vector.load %arg10[%c1_55, %c0_56, %c0_57, %c0_58] : memref<2x2x13x13xf32, #tpu.memory_space<vmem>>, vector<1x1x13x13xf32>
    %59 = vector.shape_cast %58 : vector<1x1x13x13xf32> to vector<13x13xf32>
    %cst_59 = arith.constant dense<0.000000e+00> : vector<13x13xf32>
    %60 = tpu.matmul %57, %59, %cst_59 {dimension_numbers = #tpu.dot_dimension_numbers<[1], [0], [0], [1], [0, 0, 1, 1], [], []>} : vector<13x13xf32>, vector<13x13xf32>, vector<13x13xf32> -> vector<13x13xf32>
    %61 = arith.addf %54, %60 : vector<13x13xf32>
    %c1_60 = arith.constant 1 : index
    %c1_61 = arith.constant 1 : index
    %c0_62 = arith.constant 0 : index
    %c0_63 = arith.constant 0 : index
    %62 = vector.load %arg9[%c1_60, %c1_61, %c0_62, %c0_63] : memref<2x2x13x13xf32, #tpu.memory_space<vmem>>, vector<1x1x13x13xf32>
    %63 = vector.shape_cast %62 : vector<1x1x13x13xf32> to vector<13x13xf32>
    %cst_64 = arith.constant dense<0.000000e+00> : vector<13x13xf32>
    %64 = tpu.matmul %63, %53, %cst_64 {dimension_numbers = #tpu.dot_dimension_numbers<[1], [0], [0], [1], [0, 0, 1, 1], [], []>} : vector<13x13xf32>, vector<13x13xf32>, vector<13x13xf32> -> vector<13x13xf32>
    %c1_65 = arith.constant 1 : index
    %c1_66 = arith.constant 1 : index
    %c0_67 = arith.constant 0 : index
    %c0_68 = arith.constant 0 : index
    %65 = vector.load %arg10[%c1_65, %c1_66, %c0_67, %c0_68] : memref<2x2x13x13xf32, #tpu.memory_space<vmem>>, vector<1x1x13x13xf32>
    %66 = vector.shape_cast %65 : vector<1x1x13x13xf32> to vector<13x13xf32>
    %cst_69 = arith.constant dense<0.000000e+00> : vector<13x13xf32>
    %67 = tpu.matmul %64, %66, %cst_69 {dimension_numbers = #tpu.dot_dimension_numbers<[1], [0], [0], [1], [0, 0, 1, 1], [], []>} : vector<13x13xf32>, vector<13x13xf32>, vector<13x13xf32> -> vector<13x13xf32>
    %68 = arith.addf %61, %67 : vector<13x13xf32>
    %cst_70 = arith.constant dense<0.000000e+00> : vector<9x13xf32>
    %69 = tpu.matmul %51, %68, %cst_70 {dimension_numbers = #tpu.dot_dimension_numbers<[1], [0], [0], [1], [0, 0, 1, 1], [], []>} : vector<9x13xf32>, vector<13x13xf32>, vector<9x13xf32> -> vector<9x13xf32>
    %cst_71 = arith.constant 1.250000e-01 : f32
    %70 = vector.broadcast %cst_71 : f32 to vector<9x13xf32>
    %71 = arith.mulf %69, %70 : vector<9x13xf32>
    %72 = arith.addf %51, %71 : vector<9x13xf32>
    %c0_72 = arith.constant 0 : index
    %c0_73 = arith.constant 0 : index
    %c0_74 = arith.constant 0 : index
    %73 = vector.load %arg11[%c0_72, %c0_73, %c0_74] : memref<4x9x13xf32, #tpu.memory_space<vmem>>, vector<1x9x13xf32>
    %74 = vector.shape_cast %73 : vector<1x9x13xf32> to vector<9x13xf32>
    %75 = vector.shape_cast %72 : vector<9x13xf32> to vector<1x9x13xf32>
    tpu.vector_store %arg11[%c0_72, %c0_73, %c0_74], %75 {strides = array<i32>} : memref<4x9x13xf32, #tpu.memory_space<vmem>>, vector<1x9x13xf32>,
    %76 = vector.extract_strided_slice %29 {offsets = [16, 0], sizes = [9, 13], strides = [1, 1]} : vector<64x13xf32> to vector<9x13xf32>
    %77 = vector.extract_strided_slice %76 {offsets = [0, 0], sizes = [8, 13], strides = [1, 1]} : vector<9x13xf32> to vector<8x13xf32>
    %cst_75 = arith.constant dense<0.000000e+00> : vector<13x13xf32>
    %78 = tpu.matmul %77, %77, %cst_75 {dimension_numbers = #tpu.dot_dimension_numbers<[0], [0], [1], [1], [0, 1, 1, 1], [], []>} : vector<8x13xf32>, vector<8x13xf32>, vector<13x13xf32> -> vector<13x13xf32>
    %cst_76 = arith.constant 0.000000e+00 : f32
    %79 = vector.broadcast %cst_76 : f32 to vector<13x13xf32>
    %c0_77 = arith.constant 0 : index
    %c0_78 = arith.constant 0 : index
    %c0_79 = arith.constant 0 : index
    %c0_80 = arith.constant 0 : index
    %80 = vector.load %arg9[%c0_77, %c0_78, %c0_79, %c0_80] : memref<2x2x13x13xf32, #tpu.memory_space<vmem>>, vector<1x1x13x13xf32>
    %81 = vector.shape_cast %80 : vector<1x1x13x13xf32> to vector<13x13xf32>
    %cst_81 = arith.constant dense<0.000000e+00> : vector<13x13xf32>
    %82 = tpu.matmul %81, %78, %cst_81 {dimension_numbers = #tpu.dot_dimension_numbers<[1], [0], [0], [1], [0, 0, 1, 1], [], []>} : vector<13x13xf32>, vector<13x13xf32>, vector<13x13xf32> -> vector<13x13xf32>
    %c0_82 = arith.constant 0 : index
    %c0_83 = arith.constant 0 : index
    %c0_84 = arith.constant 0 : index
    %c0_85 = arith.constant 0 : index
    %83 = vector.load %arg10[%c0_82, %c0_83, %c0_84, %c0_85] : memref<2x2x13x13xf32, #tpu.memory_space<vmem>>, vector<1x1x13x13xf32>
    %84 = vector.shape_cast %83 : vector<1x1x13x13xf32> to vector<13x13xf32>
    %cst_86 = arith.constant dense<0.000000e+00> : vector<13x13xf32>
    %85 = tpu.matmul %82, %84, %cst_86 {dimension_numbers = #tpu.dot_dimension_numbers<[1], [0], [0], [1], [0, 0, 1, 1], [], []>} : vector<13x13xf32>, vector<13x13xf32>, vector<13x13xf32> -> vector<13x13xf32>
    %86 = arith.addf %79, %85 : vector<13x13xf32>
    %c0_87 = arith.constant 0 : index
    %c1_88 = arith.constant 1 : index
    %c0_89 = arith.constant 0 : index
    %c0_90 = arith.constant 0 : index
    %87 = vector.load %arg9[%c0_87, %c1_88, %c0_89, %c0_90] : memref<2x2x13x13xf32, #tpu.memory_space<vmem>>, vector<1x1x13x13xf32>
    %88 = vector.shape_cast %87 : vector<1x1x13x13xf32> to vector<13x13xf32>
    %cst_91 = arith.constant dense<0.000000e+00> : vector<13x13xf32>
    %89 = tpu.matmul %88, %78, %cst_91 {dimension_numbers = #tpu.dot_dimension_numbers<[1], [0], [0], [1], [0, 0, 1, 1], [], []>} : vector<13x13xf32>, vector<13x13xf32>, vector<13x13xf32> -> vector<13x13xf32>
    %c0_92 = arith.constant 0 : index
    %c1_93 = arith.constant 1 : index
    %c0_94 = arith.constant 0 : index
    %c0_95 = arith.constant 0 : index
    %90 = vector.load %arg10[%c0_92, %c1_93, %c0_94, %c0_95] : memref<2x2x13x13xf32, #tpu.memory_space<vmem>>, vector<1x1x13x13xf32>
    %91 = vector.shape_cast %90 : vector<1x1x13x13xf32> to vector<13x13xf32>
    %cst_96 = arith.constant dense<0.000000e+00> : vector<13x13xf32>
    %92 = tpu.matmul %89, %91, %cst_96 {dimension_numbers = #tpu.dot_dimension_numbers<[1], [0], [0], [1], [0, 0, 1, 1], [], []>} : vector<13x13xf32>, vector<13x13xf32>, vector<13x13xf32> -> vector<13x13xf32>
    %93 = arith.addf %86, %92 : vector<13x13xf32>
    %cst_97 = arith.constant dense<0.000000e+00> : vector<9x13xf32>
    %94 = tpu.matmul %76, %93, %cst_97 {dimension_numbers = #tpu.dot_dimension_numbers<[1], [0], [0], [1], [0, 0, 1, 1], [], []>} : vector<9x13xf32>, vector<13x13xf32>, vector<9x13xf32> -> vector<9x13xf32>
    %cst_98 = arith.constant 1.250000e-01 : f32
    %95 = vector.broadcast %cst_98 : f32 to vector<9x13xf32>
    %96 = arith.mulf %94, %95 : vector<9x13xf32>
    %97 = arith.addf %76, %96 : vector<9x13xf32>
    %98 = vector.extract_strided_slice %97 {offsets = [0, 0], sizes = [8, 13], strides = [1, 1]} : vector<9x13xf32> to vector<8x13xf32>
    %cst_99 = arith.constant dense<0.000000e+00> : vector<13x13xf32>
    %99 = tpu.matmul %98, %98, %cst_99 {dimension_numbers = #tpu.dot_dimension_numbers<[0], [0], [1], [1], [0, 1, 1, 1], [], []>} : vector<8x13xf32>, vector<8x13xf32>, vector<13x13xf32> -> vector<13x13xf32>
    %cst_100 = arith.constant 0.000000e+00 : f32
    %100 = vector.broadcast %cst_100 : f32 to vector<13x13xf32>
    %c1_101 = arith.constant 1 : index
    %c0_102 = arith.constant 0 : index
    %c0_103 = arith.constant 0 : index
    %c0_104 = arith.constant 0 : index
    %101 = vector.load %arg9[%c1_101, %c0_102, %c0_103, %c0_104] : memref<2x2x13x13xf32, #tpu.memory_space<vmem>>, vector<1x1x13x13xf32>
    %102 = vector.shape_cast %101 : vector<1x1x13x13xf32> to vector<13x13xf32>
    %cst_105 = arith.constant dense<0.000000e+00> : vector<13x13xf32>
    %103 = tpu.matmul %102, %99, %cst_105 {dimension_numbers = #tpu.dot_dimension_numbers<[1], [0], [0], [1], [0, 0, 1, 1], [], []>} : vector<13x13xf32>, vector<13x13xf32>, vector<13x13xf32> -> vector<13x13xf32>
    %c1_106 = arith.constant 1 : index
    %c0_107 = arith.constant 0 : index
    %c0_108 = arith.constant 0 : index
    %c0_109 = arith.constant 0 : index
    %104 = vector.load %arg10[%c1_106, %c0_107, %c0_108, %c0_109] : memref<2x2x13x13xf32, #tpu.memory_space<vmem>>, vector<1x1x13x13xf32>
    %105 = vector.shape_cast %104 : vector<1x1x13x13xf32> to vector<13x13xf32>
    %cst_110 = arith.constant dense<0.000000e+00> : vector<13x13xf32>
    %106 = tpu.matmul %103, %105, %cst_110 {dimension_numbers = #tpu.dot_dimension_numbers<[1], [0], [0], [1], [0, 0, 1, 1], [], []>} : vector<13x13xf32>, vector<13x13xf32>, vector<13x13xf32> -> vector<13x13xf32>
    %107 = arith.addf %100, %106 : vector<13x13xf32>
    %c1_111 = arith.constant 1 : index
    %c1_112 = arith.constant 1 : index
    %c0_113 = arith.constant 0 : index
    %c0_114 = arith.constant 0 : index
    %108 = vector.load %arg9[%c1_111, %c1_112, %c0_113, %c0_114] : memref<2x2x13x13xf32, #tpu.memory_space<vmem>>, vector<1x1x13x13xf32>
    %109 = vector.shape_cast %108 : vector<1x1x13x13xf32> to vector<13x13xf32>
    %cst_115 = arith.constant dense<0.000000e+00> : vector<13x13xf32>
    %110 = tpu.matmul %109, %99, %cst_115 {dimension_numbers = #tpu.dot_dimension_numbers<[1], [0], [0], [1], [0, 0, 1, 1], [], []>} : vector<13x13xf32>, vector<13x13xf32>, vector<13x13xf32> -> vector<13x13xf32>
    %c1_116 = arith.constant 1 : index
    %c1_117 = arith.constant 1 : index
    %c0_118 = arith.constant 0 : index
    %c0_119 = arith.constant 0 : index
    %111 = vector.load %arg10[%c1_116, %c1_117, %c0_118, %c0_119] : memref<2x2x13x13xf32, #tpu.memory_space<vmem>>, vector<1x1x13x13xf32>
    %112 = vector.shape_cast %111 : vector<1x1x13x13xf32> to vector<13x13xf32>
    %cst_120 = arith.constant dense<0.000000e+00> : vector<13x13xf32>
    %113 = tpu.matmul %110, %112, %cst_120 {dimension_numbers = #tpu.dot_dimension_numbers<[1], [0], [0], [1], [0, 0, 1, 1], [], []>} : vector<13x13xf32>, vector<13x13xf32>, vector<13x13xf32> -> vector<13x13xf32>
    %114 = arith.addf %107, %113 : vector<13x13xf32>
    %cst_121 = arith.constant dense<0.000000e+00> : vector<9x13xf32>
    %115 = tpu.matmul %97, %114, %cst_121 {dimension_numbers = #tpu.dot_dimension_numbers<[1], [0], [0], [1], [0, 0, 1, 1], [], []>} : vector<9x13xf32>, vector<13x13xf32>, vector<9x13xf32> -> vector<9x13xf32>
    %cst_122 = arith.constant 1.250000e-01 : f32
    %116 = vector.broadcast %cst_122 : f32 to vector<9x13xf32>
    %117 = arith.mulf %115, %116 : vector<9x13xf32>
    %118 = arith.addf %97, %117 : vector<9x13xf32>
    %c1_123 = arith.constant 1 : index
    %c0_124 = arith.constant 0 : index
    %c0_125 = arith.constant 0 : index
    %119 = vector.load %arg11[%c1_123, %c0_124, %c0_125] : memref<4x9x13xf32, #tpu.memory_space<vmem>>, vector<1x9x13xf32>
    %120 = vector.shape_cast %119 : vector<1x9x13xf32> to vector<9x13xf32>
    %121 = vector.shape_cast %118 : vector<9x13xf32> to vector<1x9x13xf32>
    tpu.vector_store %arg11[%c1_123, %c0_124, %c0_125], %121 {strides = array<i32>} : memref<4x9x13xf32, #tpu.memory_space<vmem>>, vector<1x9x13xf32>,
    %122 = vector.extract_strided_slice %29 {offsets = [32, 0], sizes = [9, 13], strides = [1, 1]} : vector<64x13xf32> to vector<9x13xf32>
    %123 = vector.extract_strided_slice %122 {offsets = [0, 0], sizes = [8, 13], strides = [1, 1]} : vector<9x13xf32> to vector<8x13xf32>
    %cst_126 = arith.constant dense<0.000000e+00> : vector<13x13xf32>
    %124 = tpu.matmul %123, %123, %cst_126 {dimension_numbers = #tpu.dot_dimension_numbers<[0], [0], [1], [1], [0, 1, 1, 1], [], []>} : vector<8x13xf32>, vector<8x13xf32>, vector<13x13xf32> -> vector<13x13xf32>
    %cst_127 = arith.constant 0.000000e+00 : f32
    %125 = vector.broadcast %cst_127 : f32 to vector<13x13xf32>
    %c0_128 = arith.constant 0 : index
    %c0_129 = arith.constant 0 : index
    %c0_130 = arith.constant 0 : index
    %c0_131 = arith.constant 0 : index
    %126 = vector.load %arg9[%c0_128, %c0_129, %c0_130, %c0_131] : memref<2x2x13x13xf32, #tpu.memory_space<vmem>>, vector<1x1x13x13xf32>
    %127 = vector.shape_cast %126 : vector<1x1x13x13xf32> to vector<13x13xf32>
    %cst_132 = arith.constant dense<0.000000e+00> : vector<13x13xf32>
    %128 = tpu.matmul %127, %124, %cst_132 {dimension_numbers = #tpu.dot_dimension_numbers<[1], [0], [0], [1], [0, 0, 1, 1], [], []>} : vector<13x13xf32>, vector<13x13xf32>, vector<13x13xf32> -> vector<13x13xf32>
    %c0_133 = arith.constant 0 : index
    %c0_134 = arith.constant 0 : index
    %c0_135 = arith.constant 0 : index
    %c0_136 = arith.constant 0 : index
    %129 = vector.load %arg10[%c0_133, %c0_134, %c0_135, %c0_136] : memref<2x2x13x13xf32, #tpu.memory_space<vmem>>, vector<1x1x13x13xf32>
    %130 = vector.shape_cast %129 : vector<1x1x13x13xf32> to vector<13x13xf32>
    %cst_137 = arith.constant dense<0.000000e+00> : vector<13x13xf32>
    %131 = tpu.matmul %128, %130, %cst_137 {dimension_numbers = #tpu.dot_dimension_numbers<[1], [0], [0], [1], [0, 0, 1, 1], [], []>} : vector<13x13xf32>, vector<13x13xf32>, vector<13x13xf32> -> vector<13x13xf32>
    %132 = arith.addf %125, %131 : vector<13x13xf32>
    %c0_138 = arith.constant 0 : index
    %c1_139 = arith.constant 1 : index
    %c0_140 = arith.constant 0 : index
    %c0_141 = arith.constant 0 : index
    %133 = vector.load %arg9[%c0_138, %c1_139, %c0_140, %c0_141] : memref<2x2x13x13xf32, #tpu.memory_space<vmem>>, vector<1x1x13x13xf32>
    %134 = vector.shape_cast %133 : vector<1x1x13x13xf32> to vector<13x13xf32>
    %cst_142 = arith.constant dense<0.000000e+00> : vector<13x13xf32>
    %135 = tpu.matmul %134, %124, %cst_142 {dimension_numbers = #tpu.dot_dimension_numbers<[1], [0], [0], [1], [0, 0, 1, 1], [], []>} : vector<13x13xf32>, vector<13x13xf32>, vector<13x13xf32> -> vector<13x13xf32>
    %c0_143 = arith.constant 0 : index
    %c1_144 = arith.constant 1 : index
    %c0_145 = arith.constant 0 : index
    %c0_146 = arith.constant 0 : index
    %136 = vector.load %arg10[%c0_143, %c1_144, %c0_145, %c0_146] : memref<2x2x13x13xf32, #tpu.memory_space<vmem>>, vector<1x1x13x13xf32>
    %137 = vector.shape_cast %136 : vector<1x1x13x13xf32> to vector<13x13xf32>
    %cst_147 = arith.constant dense<0.000000e+00> : vector<13x13xf32>
    %138 = tpu.matmul %135, %137, %cst_147 {dimension_numbers = #tpu.dot_dimension_numbers<[1], [0], [0], [1], [0, 0, 1, 1], [], []>} : vector<13x13xf32>, vector<13x13xf32>, vector<13x13xf32> -> vector<13x13xf32>
    %139 = arith.addf %132, %138 : vector<13x13xf32>
    %cst_148 = arith.constant dense<0.000000e+00> : vector<9x13xf32>
    %140 = tpu.matmul %122, %139, %cst_148 {dimension_numbers = #tpu.dot_dimension_numbers<[1], [0], [0], [1], [0, 0, 1, 1], [], []>} : vector<9x13xf32>, vector<13x13xf32>, vector<9x13xf32> -> vector<9x13xf32>
    %cst_149 = arith.constant 1.250000e-01 : f32
    %141 = vector.broadcast %cst_149 : f32 to vector<9x13xf32>
    %142 = arith.mulf %140, %141 : vector<9x13xf32>
    %143 = arith.addf %122, %142 : vector<9x13xf32>
    %144 = vector.extract_strided_slice %143 {offsets = [0, 0], sizes = [8, 13], strides = [1, 1]} : vector<9x13xf32> to vector<8x13xf32>
    %cst_150 = arith.constant dense<0.000000e+00> : vector<13x13xf32>
    %145 = tpu.matmul %144, %144, %cst_150 {dimension_numbers = #tpu.dot_dimension_numbers<[0], [0], [1], [1], [0, 1, 1, 1], [], []>} : vector<8x13xf32>, vector<8x13xf32>, vector<13x13xf32> -> vector<13x13xf32>
    %cst_151 = arith.constant 0.000000e+00 : f32
    %146 = vector.broadcast %cst_151 : f32 to vector<13x13xf32>
    %c1_152 = arith.constant 1 : index
    %c0_153 = arith.constant 0 : index
    %c0_154 = arith.constant 0 : index
    %c0_155 = arith.constant 0 : index
    %147 = vector.load %arg9[%c1_152, %c0_153, %c0_154, %c0_155] : memref<2x2x13x13xf32, #tpu.memory_space<vmem>>, vector<1x1x13x13xf32>
    %148 = vector.shape_cast %147 : vector<1x1x13x13xf32> to vector<13x13xf32>
    %cst_156 = arith.constant dense<0.000000e+00> : vector<13x13xf32>
    %149 = tpu.matmul %148, %145, %cst_156 {dimension_numbers = #tpu.dot_dimension_numbers<[1], [0], [0], [1], [0, 0, 1, 1], [], []>} : vector<13x13xf32>, vector<13x13xf32>, vector<13x13xf32> -> vector<13x13xf32>
    %c1_157 = arith.constant 1 : index
    %c0_158 = arith.constant 0 : index
    %c0_159 = arith.constant 0 : index
    %c0_160 = arith.constant 0 : index
    %150 = vector.load %arg10[%c1_157, %c0_158, %c0_159, %c0_160] : memref<2x2x13x13xf32, #tpu.memory_space<vmem>>, vector<1x1x13x13xf32>
    %151 = vector.shape_cast %150 : vector<1x1x13x13xf32> to vector<13x13xf32>
    %cst_161 = arith.constant dense<0.000000e+00> : vector<13x13xf32>
    %152 = tpu.matmul %149, %151, %cst_161 {dimension_numbers = #tpu.dot_dimension_numbers<[1], [0], [0], [1], [0, 0, 1, 1], [], []>} : vector<13x13xf32>, vector<13x13xf32>, vector<13x13xf32> -> vector<13x13xf32>
    %153 = arith.addf %146, %152 : vector<13x13xf32>
    %c1_162 = arith.constant 1 : index
    %c1_163 = arith.constant 1 : index
    %c0_164 = arith.constant 0 : index
    %c0_165 = arith.constant 0 : index
    %154 = vector.load %arg9[%c1_162, %c1_163, %c0_164, %c0_165] : memref<2x2x13x13xf32, #tpu.memory_space<vmem>>, vector<1x1x13x13xf32>
    %155 = vector.shape_cast %154 : vector<1x1x13x13xf32> to vector<13x13xf32>
    %cst_166 = arith.constant dense<0.000000e+00> : vector<13x13xf32>
    %156 = tpu.matmul %155, %145, %cst_166 {dimension_numbers = #tpu.dot_dimension_numbers<[1], [0], [0], [1], [0, 0, 1, 1], [], []>} : vector<13x13xf32>, vector<13x13xf32>, vector<13x13xf32> -> vector<13x13xf32>
    %c1_167 = arith.constant 1 : index
    %c1_168 = arith.constant 1 : index
    %c0_169 = arith.constant 0 : index
    %c0_170 = arith.constant 0 : index
    %157 = vector.load %arg10[%c1_167, %c1_168, %c0_169, %c0_170] : memref<2x2x13x13xf32, #tpu.memory_space<vmem>>, vector<1x1x13x13xf32>
    %158 = vector.shape_cast %157 : vector<1x1x13x13xf32> to vector<13x13xf32>
    %cst_171 = arith.constant dense<0.000000e+00> : vector<13x13xf32>
    %159 = tpu.matmul %156, %158, %cst_171 {dimension_numbers = #tpu.dot_dimension_numbers<[1], [0], [0], [1], [0, 0, 1, 1], [], []>} : vector<13x13xf32>, vector<13x13xf32>, vector<13x13xf32> -> vector<13x13xf32>
    %160 = arith.addf %153, %159 : vector<13x13xf32>
    %cst_172 = arith.constant dense<0.000000e+00> : vector<9x13xf32>
    %161 = tpu.matmul %143, %160, %cst_172 {dimension_numbers = #tpu.dot_dimension_numbers<[1], [0], [0], [1], [0, 0, 1, 1], [], []>} : vector<9x13xf32>, vector<13x13xf32>, vector<9x13xf32> -> vector<9x13xf32>
    %cst_173 = arith.constant 1.250000e-01 : f32
    %162 = vector.broadcast %cst_173 : f32 to vector<9x13xf32>
    %163 = arith.mulf %161, %162 : vector<9x13xf32>
    %164 = arith.addf %143, %163 : vector<9x13xf32>
    %c2 = arith.constant 2 : index
    %c0_174 = arith.constant 0 : index
    %c0_175 = arith.constant 0 : index
    %165 = vector.load %arg11[%c2, %c0_174, %c0_175] : memref<4x9x13xf32, #tpu.memory_space<vmem>>, vector<1x9x13xf32>
    %166 = vector.shape_cast %165 : vector<1x9x13xf32> to vector<9x13xf32>
    %167 = vector.shape_cast %164 : vector<9x13xf32> to vector<1x9x13xf32>
    tpu.vector_store %arg11[%c2, %c0_174, %c0_175], %167 {strides = array<i32>} : memref<4x9x13xf32, #tpu.memory_space<vmem>>, vector<1x9x13xf32>,
    %168 = vector.extract_strided_slice %29 {offsets = [48, 0], sizes = [9, 13], strides = [1, 1]} : vector<64x13xf32> to vector<9x13xf32>
    %169 = vector.extract_strided_slice %168 {offsets = [0, 0], sizes = [8, 13], strides = [1, 1]} : vector<9x13xf32> to vector<8x13xf32>
    %cst_176 = arith.constant dense<0.000000e+00> : vector<13x13xf32>
    %170 = tpu.matmul %169, %169, %cst_176 {dimension_numbers = #tpu.dot_dimension_numbers<[0], [0], [1], [1], [0, 1, 1, 1], [], []>} : vector<8x13xf32>, vector<8x13xf32>, vector<13x13xf32> -> vector<13x13xf32>
    %cst_177 = arith.constant 0.000000e+00 : f32
    %171 = vector.broadcast %cst_177 : f32 to vector<13x13xf32>
    %c0_178 = arith.constant 0 : index
    %c0_179 = arith.constant 0 : index
    %c0_180 = arith.constant 0 : index
    %c0_181 = arith.constant 0 : index
    %172 = vector.load %arg9[%c0_178, %c0_179, %c0_180, %c0_181] : memref<2x2x13x13xf32, #tpu.memory_space<vmem>>, vector<1x1x13x13xf32>
    %173 = vector.shape_cast %172 : vector<1x1x13x13xf32> to vector<13x13xf32>
    %cst_182 = arith.constant dense<0.000000e+00> : vector<13x13xf32>
    %174 = tpu.matmul %173, %170, %cst_182 {dimension_numbers = #tpu.dot_dimension_numbers<[1], [0], [0], [1], [0, 0, 1, 1], [], []>} : vector<13x13xf32>, vector<13x13xf32>, vector<13x13xf32> -> vector<13x13xf32>
    %c0_183 = arith.constant 0 : index
    %c0_184 = arith.constant 0 : index
    %c0_185 = arith.constant 0 : index
    %c0_186 = arith.constant 0 : index
    %175 = vector.load %arg10[%c0_183, %c0_184, %c0_185, %c0_186] : memref<2x2x13x13xf32, #tpu.memory_space<vmem>>, vector<1x1x13x13xf32>
    %176 = vector.shape_cast %175 : vector<1x1x13x13xf32> to vector<13x13xf32>
    %cst_187 = arith.constant dense<0.000000e+00> : vector<13x13xf32>
    %177 = tpu.matmul %174, %176, %cst_187 {dimension_numbers = #tpu.dot_dimension_numbers<[1], [0], [0], [1], [0, 0, 1, 1], [], []>} : vector<13x13xf32>, vector<13x13xf32>, vector<13x13xf32> -> vector<13x13xf32>
    %178 = arith.addf %171, %177 : vector<13x13xf32>
    %c0_188 = arith.constant 0 : index
    %c1_189 = arith.constant 1 : index
    %c0_190 = arith.constant 0 : index
    %c0_191 = arith.constant 0 : index
    %179 = vector.load %arg9[%c0_188, %c1_189, %c0_190, %c0_191] : memref<2x2x13x13xf32, #tpu.memory_space<vmem>>, vector<1x1x13x13xf32>
    %180 = vector.shape_cast %179 : vector<1x1x13x13xf32> to vector<13x13xf32>
    %cst_192 = arith.constant dense<0.000000e+00> : vector<13x13xf32>
    %181 = tpu.matmul %180, %170, %cst_192 {dimension_numbers = #tpu.dot_dimension_numbers<[1], [0], [0], [1], [0, 0, 1, 1], [], []>} : vector<13x13xf32>, vector<13x13xf32>, vector<13x13xf32> -> vector<13x13xf32>
    %c0_193 = arith.constant 0 : index
    %c1_194 = arith.constant 1 : index
    %c0_195 = arith.constant 0 : index
    %c0_196 = arith.constant 0 : index
    %182 = vector.load %arg10[%c0_193, %c1_194, %c0_195, %c0_196] : memref<2x2x13x13xf32, #tpu.memory_space<vmem>>, vector<1x1x13x13xf32>
    %183 = vector.shape_cast %182 : vector<1x1x13x13xf32> to vector<13x13xf32>
    %cst_197 = arith.constant dense<0.000000e+00> : vector<13x13xf32>
    %184 = tpu.matmul %181, %183, %cst_197 {dimension_numbers = #tpu.dot_dimension_numbers<[1], [0], [0], [1], [0, 0, 1, 1], [], []>} : vector<13x13xf32>, vector<13x13xf32>, vector<13x13xf32> -> vector<13x13xf32>
    %185 = arith.addf %178, %184 : vector<13x13xf32>
    %cst_198 = arith.constant dense<0.000000e+00> : vector<9x13xf32>
    %186 = tpu.matmul %168, %185, %cst_198 {dimension_numbers = #tpu.dot_dimension_numbers<[1], [0], [0], [1], [0, 0, 1, 1], [], []>} : vector<9x13xf32>, vector<13x13xf32>, vector<9x13xf32> -> vector<9x13xf32>
    %cst_199 = arith.constant 1.250000e-01 : f32
    %187 = vector.broadcast %cst_199 : f32 to vector<9x13xf32>
    %188 = arith.mulf %186, %187 : vector<9x13xf32>
    %189 = arith.addf %168, %188 : vector<9x13xf32>
    %190 = vector.extract_strided_slice %189 {offsets = [0, 0], sizes = [8, 13], strides = [1, 1]} : vector<9x13xf32> to vector<8x13xf32>
    %cst_200 = arith.constant dense<0.000000e+00> : vector<13x13xf32>
    %191 = tpu.matmul %190, %190, %cst_200 {dimension_numbers = #tpu.dot_dimension_numbers<[0], [0], [1], [1], [0, 1, 1, 1], [], []>} : vector<8x13xf32>, vector<8x13xf32>, vector<13x13xf32> -> vector<13x13xf32>
    %cst_201 = arith.constant 0.000000e+00 : f32
    %192 = vector.broadcast %cst_201 : f32 to vector<13x13xf32>
    %c1_202 = arith.constant 1 : index
    %c0_203 = arith.constant 0 : index
    %c0_204 = arith.constant 0 : index
    %c0_205 = arith.constant 0 : index
    %193 = vector.load %arg9[%c1_202, %c0_203, %c0_204, %c0_205] : memref<2x2x13x13xf32, #tpu.memory_space<vmem>>, vector<1x1x13x13xf32>
    %194 = vector.shape_cast %193 : vector<1x1x13x13xf32> to vector<13x13xf32>
    %cst_206 = arith.constant dense<0.000000e+00> : vector<13x13xf32>
    %195 = tpu.matmul %194, %191, %cst_206 {dimension_numbers = #tpu.dot_dimension_numbers<[1], [0], [0], [1], [0, 0, 1, 1], [], []>} : vector<13x13xf32>, vector<13x13xf32>, vector<13x13xf32> -> vector<13x13xf32>
    %c1_207 = arith.constant 1 : index
    %c0_208 = arith.constant 0 : index
    %c0_209 = arith.constant 0 : index
    %c0_210 = arith.constant 0 : index
    %196 = vector.load %arg10[%c1_207, %c0_208, %c0_209, %c0_210] : memref<2x2x13x13xf32, #tpu.memory_space<vmem>>, vector<1x1x13x13xf32>
    %197 = vector.shape_cast %196 : vector<1x1x13x13xf32> to vector<13x13xf32>
    %cst_211 = arith.constant dense<0.000000e+00> : vector<13x13xf32>
    %198 = tpu.matmul %195, %197, %cst_211 {dimension_numbers = #tpu.dot_dimension_numbers<[1], [0], [0], [1], [0, 0, 1, 1], [], []>} : vector<13x13xf32>, vector<13x13xf32>, vector<13x13xf32> -> vector<13x13xf32>
    %199 = arith.addf %192, %198 : vector<13x13xf32>
    %c1_212 = arith.constant 1 : index
    %c1_213 = arith.constant 1 : index
    %c0_214 = arith.constant 0 : index
    %c0_215 = arith.constant 0 : index
    %200 = vector.load %arg9[%c1_212, %c1_213, %c0_214, %c0_215] : memref<2x2x13x13xf32, #tpu.memory_space<vmem>>, vector<1x1x13x13xf32>
    %201 = vector.shape_cast %200 : vector<1x1x13x13xf32> to vector<13x13xf32>
    %cst_216 = arith.constant dense<0.000000e+00> : vector<13x13xf32>
    %202 = tpu.matmul %201, %191, %cst_216 {dimension_numbers = #tpu.dot_dimension_numbers<[1], [0], [0], [1], [0, 0, 1, 1], [], []>} : vector<13x13xf32>, vector<13x13xf32>, vector<13x13xf32> -> vector<13x13xf32>
    %c1_217 = arith.constant 1 : index
    %c1_218 = arith.constant 1 : index
    %c0_219 = arith.constant 0 : index
    %c0_220 = arith.constant 0 : index
    %203 = vector.load %arg10[%c1_217, %c1_218, %c0_219, %c0_220] : memref<2x2x13x13xf32, #tpu.memory_space<vmem>>, vector<1x1x13x13xf32>
    %204 = vector.shape_cast %203 : vector<1x1x13x13xf32> to vector<13x13xf32>
    %cst_221 = arith.constant dense<0.000000e+00> : vector<13x13xf32>
    %205 = tpu.matmul %202, %204, %cst_221 {dimension_numbers = #tpu.dot_dimension_numbers<[1], [0], [0], [1], [0, 0, 1, 1], [], []>} : vector<13x13xf32>, vector<13x13xf32>, vector<13x13xf32> -> vector<13x13xf32>
    %206 = arith.addf %199, %205 : vector<13x13xf32>
    %cst_222 = arith.constant dense<0.000000e+00> : vector<9x13xf32>
    %207 = tpu.matmul %189, %206, %cst_222 {dimension_numbers = #tpu.dot_dimension_numbers<[1], [0], [0], [1], [0, 0, 1, 1], [], []>} : vector<9x13xf32>, vector<13x13xf32>, vector<9x13xf32> -> vector<9x13xf32>
    %cst_223 = arith.constant 1.250000e-01 : f32
    %208 = vector.broadcast %cst_223 : f32 to vector<9x13xf32>
    %209 = arith.mulf %207, %208 : vector<9x13xf32>
    %210 = arith.addf %189, %209 : vector<9x13xf32>
    %c3 = arith.constant 3 : index
    %c0_224 = arith.constant 0 : index
    %c0_225 = arith.constant 0 : index
    %211 = vector.load %arg11[%c3, %c0_224, %c0_225] : memref<4x9x13xf32, #tpu.memory_space<vmem>>, vector<1x9x13xf32>
    %212 = vector.shape_cast %211 : vector<1x9x13xf32> to vector<9x13xf32>
    %213 = vector.shape_cast %210 : vector<9x13xf32> to vector<1x9x13xf32>
    tpu.vector_store %arg11[%c3, %c0_224, %c0_225], %213 {strides = array<i32>} : memref<4x9x13xf32, #tpu.memory_space<vmem>>, vector<1x9x13xf32>,
    return
  }
  func.func @transform_0(%arg0: i32) -> (i32, i32) {
    %c0_i32 = arith.constant 0 : i32
    %c0_i32_0 = arith.constant 0 : i32
    return %arg0, %c0_i32 : i32, i32
  }
  func.func @transform_1(%arg0: i32) -> (i32, i32) {
    %c0_i32 = arith.constant 0 : i32
    %c0_i32_0 = arith.constant 0 : i32
    %c0_i32_1 = arith.constant 0 : i32
    return %c0_i32, %c0_i32_0 : i32, i32
  }
  func.func @transform_2(%arg0: i32) -> (i32, i32) {
    %c0_i32 = arith.constant 0 : i32
    %c0_i32_0 = arith.constant 0 : i32
    %c0_i32_1 = arith.constant 0 : i32
    return %c0_i32, %c0_i32_0 : i32, i32
  }
  func.func @transform_3(%arg0: i32) -> (i32, i32) {
    %c0_i32 = arith.constant 0 : i32
    %c0_i32_0 = arith.constant 0 : i32
    %c0_i32_1 = arith.constant 0 : i32
    return %c0_i32, %c0_i32_0 : i32, i32
  }
  func.func @transform_4(%arg0: i32) -> (i32, i32) {
    %c0_i32 = arith.constant 0 : i32
    %c0_i32_0 = arith.constant 0 : i32
    %c0_i32_1 = arith.constant 0 : i32
    return %c0_i32, %c0_i32_0 : i32, i32
  }
  func.func @transform_5(%arg0: i32) -> (i32, i32) {
    %c0_i32 = arith.constant 0 : i32
    %c0_i32_0 = arith.constant 0 : i32
    %c0_i32_1 = arith.constant 0 : i32
    return %c0_i32, %c0_i32_0 : i32, i32
  }
  func.func @transform_6(%arg0: i32) -> (i32, i32) {
    %c0_i32 = arith.constant 0 : i32
    %c0_i32_0 = arith.constant 0 : i32
    %c0_i32_1 = arith.constant 0 : i32
    return %c0_i32, %c0_i32_0 : i32, i32
  }
  func.func @transform_7(%arg0: i32) -> (i32, i32) {
    %c0_i32 = arith.constant 0 : i32
    %c0_i32_0 = arith.constant 0 : i32
    %c0_i32_1 = arith.constant 0 : i32
    return %c0_i32, %c0_i32_0 : i32, i32
  }
  func.func @transform_8(%arg0: i32) -> (i32, i32, i32, i32) {
    %c0_i32 = arith.constant 0 : i32
    %c0_i32_0 = arith.constant 0 : i32
    %c0_i32_1 = arith.constant 0 : i32
    %c0_i32_2 = arith.constant 0 : i32
    %c0_i32_3 = arith.constant 0 : i32
    return %c0_i32, %c0_i32_0, %c0_i32_1, %c0_i32_2 : i32, i32, i32, i32
  }
  func.func @transform_9(%arg0: i32) -> (i32, i32, i32, i32) {
    %c0_i32 = arith.constant 0 : i32
    %c0_i32_0 = arith.constant 0 : i32
    %c0_i32_1 = arith.constant 0 : i32
    %c0_i32_2 = arith.constant 0 : i32
    %c0_i32_3 = arith.constant 0 : i32
    return %c0_i32, %c0_i32_0, %c0_i32_1, %c0_i32_2 : i32, i32, i32, i32
  }
  func.func @transform_10(%arg0: i32) -> (i32, i32, i32) {
    %c0_i32 = arith.constant 0 : i32
    %c0_i32_0 = arith.constant 0 : i32
    %c0_i32_1 = arith.constant 0 : i32
    return %arg0, %c0_i32, %c0_i32_0 : i32, i32, i32
  }
}

</mosaic_0001>

<bundles_post_ra>
// kernel: tile.8
= control target key start
LH: loop header
LB: loop body
LE: loop exit
PB: predicated region body
PF: predicated region fallthrough
CT: control target
= control target key end

     0   :  { %s22_s0 = inlined_call_operand.vmem [shape: f32[16], index: 0, kind: input, shape index: {}]   ;;  %s23_s1 = inlined_call_operand.vmem [shape: f32[4,16], index: 1, kind: output, shape index: {}]  }
   0x1   :  { %v4_v0 = vld [vmem:[%s22_s0] ss:$0 sm:$0xff] }
   0x2   :  { %5 = vst [vmem:[%s23_s1] sm:$0xf] %v4_v0 }

// kernel: tile.0
= control target key start
LH: loop header
LB: loop body
LE: loop exit
PB: predicated region body
PF: predicated region fallthrough
CT: control target
= control target key end

     0   :  { %s177_s8 = smov 125   ;;  %s178_s9 = smov 126   ;;  %vm8_vm0 = vcmask 7168   ;;  %s332_s0 = inlined_call_operand.vmem [shape: f32[4,16], index: 0, kind: input, shape index: {}]   ;;  %s333_s1 = inlined_call_operand.vmem [shape: f32[64,1], index: 1, kind: output, shape index: {}]  }
   0x1   :  { %v5_v0 = vld [vmem:[%s332_s0] sm:$0xf]  ;;  %s176_s0 = smov 127   ;;  %s179_s10 = smov 124  }
   0x2   :  { %6 = vst [vmem:[#allocation0] sm:$0xf] %v5_v0  ;;  %s180_s11 = smov 123   ;;  %s181_s12 = smov 122  }
   0x3   :  { %s182_s13 = smov 121   ;;  %s183_s14 = smov 120  }
   0x4   :  { %s184_s19 = smov 119   ;;  %s185_s20 = smov 118  }
   0x5   :  { %s186_s21 = smov 117   ;;  %s187_s22 = smov 116  }
   0x6   :  { %s188_s23 = smov 115   ;;  %s189_s24 = smov 114  }
   0x7   :  { %s190_s25 = smov 113  }
   0x9   :  { %v11_v1 = vld [vmem:[#allocation0] sm:$0xf]  }
   0xa   :  { %v27_v2 = vld [vmem:[#allocation0] sm:$0xf]   ;;  %12 = vrot.lane.b32.xlu0 %v11_v1, %s176_s0 }
   0xb   :  { %28 = vrot.lane.b32.xlu1 %v27_v2, %s177_s8  ;;  %v19_v3 = vld [vmem:[#allocation0] sm:$0xf]  }
   0xc   :  { %v35_v4 = vld [vmem:[#allocation0] sm:$0xf]  }
   0xd   :  { %v43_v5 = vld [vmem:[#allocation0] sm:$0xf]  }
   0xe   :  { %20 = vrot.lane.b32.xlu0 %v19_v3, %s178_s9  ;;  %v51_v6 = vld [vmem:[#allocation0] sm:$0xf]  }
   0xf   :  { %36 = vrot.lane.b32.xlu1 %v35_v4, %s179_s10  ;;  %v59_v7 = vld [vmem:[#allocation0] sm:$0xf]  }
  0x10   :  { %v67_v8 = vld [vmem:[#allocation0] sm:$0xf]  }
  0x11   :  { %v75_v9 = vld [vmem:[#allocation0] sm:$0xf]  }
  0x12   :  { %44 = vrot.lane.b32.xlu0 %v43_v5, %s180_s11  ;;  %v83_v10 = vld [vmem:[#allocation0] sm:$0xf]  }
  0x13   :  { %52 = vrot.lane.b32.xlu1 %v51_v6, %s181_s12  ;;  %v7_v11 = vld [vmem:[#allocation0] sm:$0xf]  }
  0x14   :  { %9 = vst.msk [vmem:[%s333_s1] ss:$16 sm:$0x3] %vm8_vm0, %v7_v11   ;;  %10 = vst.msk [vmem:[%s333_s1] ss:$16 sm:$0xc] %vm8_vm0, %v7_v11  }
  0x15   :  { %v91_v12 = vld [vmem:[#allocation0] sm:$0xf]  }
  0x16   :  { %60 = vrot.lane.b32.xlu0 %v59_v7, %s182_s13  ;;  %v99_v13 = vld [vmem:[#allocation0] sm:$0xf]  }
  0x17   :  { %68 = vrot.lane.b32.xlu1 %v67_v8, %s183_s14  ;;  %v107_v14 = vld [vmem:[#allocation0] sm:$0xf]  }
  0x18   :  { %v115_v15 = vld [vmem:[#allocation0] sm:$0xf]  }
  0x19   :  { %v123_v16 = vld [vmem:[#allocation0] sm:$0xf]  }
  0x1a   :  { %76 = vrot.lane.b32.xlu0 %v75_v9, %s184_s19 }
  0x1b   :  { %84 = vrot.lane.b32.xlu1 %v83_v10, %s185_s20 }
  0x1e   :  { %92 = vrot.lane.b32.xlu0 %v91_v12, %s186_s21 }
  0x1f   :  { %100 = vrot.lane.b32.xlu1 %v99_v13, %s187_s22 }
  0x22   :  { %108 = vrot.lane.b32.xlu0 %v107_v14, %s188_s23 }
  0x23   :  { %116 = vrot.lane.b32.xlu1 %v115_v15, %s189_s24 }
  0x26   :  { %124 = vrot.lane.b32.xlu0 %v123_v16, %s190_s25 }
  0x7c   :  { %v13_v17 = vpop.permute.xlu0 %12  }
  0x7d   :  { %v29_v18 = vpop.permute.xlu1 %28   ;;  %131 = vst.msk [vmem:[%s333_s1 + $0x1] ss:$16 sm:$0x3] %vm8_vm0, %v13_v17   ;;  %132 = vst.msk [vmem:[%s333_s1 + $0x1] ss:$16 sm:$0xc] %vm8_vm0, %v13_v17  }
  0x7e   :  { %135 = vst.msk [vmem:[%s333_s1 + $0x3] ss:$16 sm:$0x3] %vm8_vm0, %v29_v18   ;;  %136 = vst.msk [vmem:[%s333_s1 + $0x3] ss:$16 sm:$0xc] %vm8_vm0, %v29_v18  }
  0x80   :  { %v21_v19 = vpop.permute.xlu0 %20  }
  0x81   :  { %v37_v20 = vpop.permute.xlu1 %36   ;;  %133 = vst.msk [vmem:[%s333_s1 + $0x2] ss:$16 sm:$0x3] %vm8_vm0, %v21_v19   ;;  %134 = vst.msk [vmem:[%s333_s1 + $0x2] ss:$16 sm:$0xc] %vm8_vm0, %v21_v19  }
  0x82   :  { %137 = vst.msk [vmem:[%s333_s1 + $0x4] ss:$16 sm:$0x3] %vm8_vm0, %v37_v20   ;;  %138 = vst.msk [vmem:[%s333_s1 + $0x4] ss:$16 sm:$0xc] %vm8_vm0, %v37_v20  }
  0x84   :  { %v45_v21 = vpop.permute.xlu0 %44  }
  0x85   :  { %v53_v22 = vpop.permute.xlu1 %52   ;;  %139 = vst.msk [vmem:[%s333_s1 + $0x5] ss:$16 sm:$0x3] %vm8_vm0, %v45_v21   ;;  %140 = vst.msk [vmem:[%s333_s1 + $0x5] ss:$16 sm:$0xc] %vm8_vm0, %v45_v21  }
  0x86   :  { %141 = vst.msk [vmem:[%s333_s1 + $0x6] ss:$16 sm:$0x3] %vm8_vm0, %v53_v22   ;;  %142 = vst.msk [vmem:[%s333_s1 + $0x6] ss:$16 sm:$0xc] %vm8_vm0, %v53_v22  }
  0x88   :  { %v61_v23 = vpop.permute.xlu0 %60  }
  0x89   :  { %v69_v24 = vpop.permute.xlu1 %68   ;;  %143 = vst.msk [vmem:[%s333_s1 + $0x7] ss:$16 sm:$0x3] %vm8_vm0, %v61_v23   ;;  %144 = vst.msk [vmem:[%s333_s1 + $0x7] ss:$16 sm:$0xc] %vm8_vm0, %v61_v23  }
  0x8a   :  { %145 = vst.msk [vmem:[%s333_s1 + $0x8] ss:$16 sm:$0x3] %vm8_vm0, %v69_v24   ;;  %146 = vst.msk [vmem:[%s333_s1 + $0x8] ss:$16 sm:$0xc] %vm8_vm0, %v69_v24  }
  0x8c   :  { %v77_v25 = vpop.permute.xlu0 %76  }
  0x8d   :  { %v85_v26 = vpop.permute.xlu1 %84   ;;  %147 = vst.msk [vmem:[%s333_s1 + $0x9] ss:$16 sm:$0x3] %vm8_vm0, %v77_v25   ;;  %148 = vst.msk [vmem:[%s333_s1 + $0x9] ss:$16 sm:$0xc] %vm8_vm0, %v77_v25  }
  0x8e   :  { %149 = vst.msk [vmem:[%s333_s1 + $0xa] ss:$16 sm:$0x3] %vm8_vm0, %v85_v26   ;;  %150 = vst.msk [vmem:[%s333_s1 + $0xa] ss:$16 sm:$0xc] %vm8_vm0, %v85_v26  }
  0x90   :  { %v93_v27 = vpop.permute.xlu0 %92  }
  0x91   :  { %v101_v28 = vpop.permute.xlu1 %100   ;;  %151 = vst.msk [vmem:[%s333_s1 + $0xb] ss:$16 sm:$0x3] %vm8_vm0, %v93_v27   ;;  %152 = vst.msk [vmem:[%s333_s1 + $0xb] ss:$16 sm:$0xc] %vm8_vm0, %v93_v27  }
  0x92   :  { %153 = vst.msk [vmem:[%s333_s1 + $0xc] ss:$16 sm:$0x3] %vm8_vm0, %v101_v28   ;;  %154 = vst.msk [vmem:[%s333_s1 + $0xc] ss:$16 sm:$0xc] %vm8_vm0, %v101_v28  }
  0x94   :  { %v109_v29 = vpop.permute.xlu0 %108  }
  0x95   :  { %v117_v30 = vpop.permute.xlu1 %116   ;;  %155 = vst.msk [vmem:[%s333_s1 + $0xd] ss:$16 sm:$0x3] %vm8_vm0, %v109_v29   ;;  %156 = vst.msk [vmem:[%s333_s1 + $0xd] ss:$16 sm:$0xc] %vm8_vm0, %v109_v29  }
  0x96   :  { %157 = vst.msk [vmem:[%s333_s1 + $0xe] ss:$16 sm:$0x3] %vm8_vm0, %v117_v30   ;;  %158 = vst.msk [vmem:[%s333_s1 + $0xe] ss:$16 sm:$0xc] %vm8_vm0, %v117_v30  }
  0x98   :  { %v125_v31 = vpop.permute.xlu0 %124  }
  0x99   :  { %159 = vst.msk [vmem:[%s333_s1 + $0xf] ss:$16 sm:$0x3] %vm8_vm0, %v125_v31   ;;  %160 = vst.msk [vmem:[%s333_s1 + $0xf] ss:$16 sm:$0xc] %vm8_vm0, %v125_v31  }

// kernel: transformer_forward.1
= control target key start
LH: loop header
LB: loop body
LE: loop exit
PB: predicated region body
PF: predicated region fallthrough
CT: control target
= control target key end

     0   :  { %s6287_s13 = smov 0   ;;  %s6896_s0 = inlined_call_operand.vmem [shape: f32[128,5], index: 0, kind: input, shape index: {}]   ;;  %s6897_s1 = inlined_call_operand.vmem [shape: f32[64,1], index: 1, kind: input, shape index: {}]   ;;  %s6898_s2 = inlined_call_operand.vmem [shape: f32[5,24], index: 2, kind: input, shape index: {}]   ;;  %s6899_s3 = inlined_call_operand.vmem [shape: f32[1,24], index: 3, kind: input, shape index: {}]   ;;  %s6900_s4 = inlined_call_operand.vmem [shape: f32[24,24], index: 4, kind: input, shape index: {}]   ;;  %s6901_s5 = inlined_call_operand.vmem [shape: f32[1,24], index: 5, kind: input, shape index: {}]   ;;  %s6902_s6 = inlined_call_operand.vmem [shape: f32[24,8], index: 6, kind: input, shape index: {}]   ;;  %s6903_s7 = inlined_call_operand.vmem [shape: f32[1,8], index: 7, kind: input, shape index: {}]   ;;  %s6904_s8 = inlined_call_operand.vmem [shape: f32[2,2,13,13], index: 8, kind: input, shape index: {}]   ;;  %s6905_s9 = inlined_call_operand.vmem [shape: f32[2,2,13,13], index: 9, kind: input, shape index: {}]   ;;  %s6906_s10 = inlined_call_operand.vmem [shape: f32[8,9,13], index: 10, kind: output, shape index: {}]  }
   0x1 LB: > { %s5393_s14 = sadd.s32 4294967295, %s6228_s13   ;;  %p5397_p0 = scmp.ge.s32.totalorder %s6228_s13, 1  ;;  %s6228_s13 = sphi %s6287_s13, %s20_s13  }
   0x2   : > { %p313_p1 = scmp.lt.s32.totalorder %s6228_s13, 3 }
   0x4   : > { %p314_p2 = pnand %p5397_p0, %p313_p1 }
   0x5   : > { %s5398_s17 = sshll.u32 (!%p314_p2), %s5393_s14, 3  ;;  %s6231_s26 = smov (!%p314_p2), 5  }
   0x6   : > { %317 = sbr.rel (%p314_p2) target bundleno = 6545 (0x1991), region = 60  ;;  %p353_p3 = scmp.lt.s32.totalorder (!%p314_p2), %s5398_s17, 15 }
   0xb   : > { %v373_v0 = vld [vmem:[%s6898_s2] sm:$0x1f]  ;;  %vm406_vm0 = vcmask 1044480   ;;  %s6908_s17 = smov (!%p353_p3, %s5398_s17), 15  ;;  %vm381_vm1 = vcmask 39936   ;;  %v525_v3 = vld [vmem:[%s6900_s4 + $0x10] sm:$0xff] }
   0xc   : > { %5839 = vmatprep.subr.msk.mxu0 %vm406_vm0, %v373_v0  ;;  %s5399_s18 = sshll.u32 %s6908_s17, 3  ;;  %5853 = vmatprep.subr.mxu1 %v525_v3  ;;  %v524_v4 = vld [vmem:[%s6900_s4 + $0x8] sm:$0xff]  ;;  %v523_v5 = vld [vmem:[%s6900_s4] sm:$0xff]  ;;  %v673_v10 = vld [vmem:[%s6902_s6 + $0x10] sm:$0xff]  ;;  %vm533_vm2 = vcmask 195584   ;;  %v6230_v24 = vmov 0  }
   0xd   : > { %5840 = vmatpush3.msk.msra.mxu0 %vm406_vm0, %v373_v0  ;;  %s356_s21 = scalar_lea.vmem %s6896_s0, %s5399_s18  ;;  %5854 = vmatpush3.msra.mxu1 %v525_v3  ;;  %v672_v13 = vld [vmem:[%s6902_s6 + $0x8] sm:$0xff]  ;;  %v5403_v14 = vld [vmem:[%s6899_s3] ss:$0 sm:$0xff]  ;;  %vm962_vm3 = vcmask 105512   ;;  %vm1011_vm4 = vcmask 64512   ;;  %vm1095_vm5 = vcmask 105472  }
   0xe   : > { %v365_v1 = vld [vmem:[%s356_s21] sm:$0xff]  ;;  %v366_v2 = vld [vmem:[%s356_s21 + $0x8] sm:$0xff]  ;;  %5855 = vmatprep.subr.mxu1 %v524_v4  ;;  %v367_v6 = vld [vmem:[%s356_s21 + $0x10] sm:$0xff]  ;;  %5871 = vmatprep.subr.mxu0 %v673_v10  ;;  %vm2072_vm6 = vcmask 98304  }
   0xf   : > { %5841 = vmatprep.mubr.msk.f32.mxu0 %vm381_vm1, %v365_v1  ;;  %922 = vst.msk [vmem:[#allocation2] sm:$0xff] %vm381_vm1, %v365_v1  ;;  %923 = vst.msk [vmem:[#allocation2 + $0x8] sm:$0xff] %vm381_vm1, %v366_v2  ;;  %5856 = vmatpush3.msra.mxu1 %v524_v4  ;;  %v368_v7 = vld [vmem:[%s356_s21 + $0x18] sm:$0xff]  ;;  %v369_v8 = vld [vmem:[%s356_s21 + $0x20] sm:$0xff] }
  0x10   : > { %5842 = vmatmul.mubr.msk.f32.vlgmr.msra.gmra.mxu0 %vm381_vm1, %v366_v2  ;;  %5857 = vmatprep.subr.mxu1 %v523_v5  ;;  %924 = vst.msk [vmem:[#allocation2 + $0x10] sm:$0xff] %vm381_vm1, %v367_v6  ;;  %925 = vst.msk [vmem:[#allocation2 + $0x18] sm:$0xff] %vm381_vm1, %v368_v7  ;;  %v370_v9 = vld [vmem:[%s356_s21 + $0x28] sm:$0xff]  ;;  %v371_v11 = vld [vmem:[%s356_s21 + $0x30] sm:$0xff] }
  0x11   : > { %5858 = vmatpush3.msra.mxu1 %v523_v5  ;;  %5844 = vmatprep.mubr.msk.f32.mxu0 %vm381_vm1, %v367_v6  ;;  %926 = vst.msk [vmem:[#allocation2 + $0x20] sm:$0xff] %vm381_vm1, %v369_v8  ;;  %927 = vst.msk [vmem:[#allocation2 + $0x28] sm:$0xff] %vm381_vm1, %v370_v9  ;;  %v372_v12 = vld [vmem:[%s356_s21 + $0x38] sm:$0xff]  ;;  %v671_v21 = vld [vmem:[%s6902_s6] sm:$0xff]  ;;  %s5400_s21 = sshll.u32 %s5393_s14, 2 }
  0x12   : > { %928 = vst.msk [vmem:[#allocation2 + $0x30] sm:$0xff] %vm381_vm1, %v371_v11  ;;  %5872 = vmatpush3.msra.mxu0 %v673_v10  ;;  %929 = vst.msk [vmem:[#allocation2 + $0x38] sm:$0xff] %vm381_vm1, %v372_v12  ;;  %v810_v22 = vld [vmem:[%s6897_s1] sm:$0xff]  ;;  %6220 = vset.pattern.permute.xlu0 %v6230_v24  ;;  %v811_v29 = vld [vmem:[%s6897_s1 + $0x8] sm:$0xff]  ;;  %p359_p4 = scmp.lt.s32.totalorder %s5400_s21, 7 }
  0x13   : > { %5873 = vmatprep.subr.mxu0 %v672_v13  ;;  %v818_v25 = vsub.f32 1.0, %v810_v22  ;;  %v819_v35 = vsub.f32 1.0, %v811_v29  ;;  %v5413_v45 = vld [vmem:[%s6901_s5] ss:$0 sm:$0xff] }
  0x14   : > { %5845 = vmatmul.mubr.msk.f32.gmra.mxu0 %vm381_vm1, %v368_v7  ;;  %v6365_v55 = vld [vmem:[%s6903_s7] ss:$0 sm:$0xff]  ;;  %s6910_s21 = smov (!%p359_p4, %s5400_s21), 7 }
  0x15   : > { %5847 = vmatprep.mubr.msk.f32.mxu0 %vm381_vm1, %v369_v8  ;;  %5874 = vmatpush3.msra.mxu0 %v672_v13  ;;  %s5623_s22 = sshll.u32 %s6910_s21, 4 }
  0x16   : > { %5875 = vmatprep.subr.mxu0 %v671_v21  ;;  %828 = vperm.xlu0 %6220, %v818_v25   ;;  %s6592_s25 = scalar_lea.vmem %s6906_s10, %s5623_s22 }
  0x17   : > { %5876 = vmatpush3.msra.mxu0 %v671_v21 }
  0x18   : > { %5848 = vmatmul.mubr.msk.f32.gmra.mxu0 %vm381_vm1, %v370_v9 }
  0x19   : > { %5850 = vmatprep.mubr.msk.f32.mxu0 %vm381_vm1, %v371_v11 }
  0x1a   : > { %876 = vperm.xlu0 %6220, %v810_v22   ;;  %v6387_v22 = vld [vmem:[%s6897_s1 + $0x10] sm:$0xff] }
  0x1c   : > { %5851 = vmatmul.mubr.msk.f32.gmra.mxu0 %vm381_vm1, %v372_v12 }
  0x1e   : > { %833 = vperm.xlu0 %6220, %v819_v35   ;;  %v6438_v35 = vld [vmem:[%s6905_s9] sm:$0xff] }
  0x22   : > { %881 = vperm.xlu0 %6220, %v811_v29  }
  0x91   : > { %v829_v52 = vpop.permute.xlu0 %828 }
  0x95   : > { %v877_v53 = vpop.permute.xlu0 %876 }
  0x99   : > { %v834_v54 = vpop.permute.xlu0 %833 }
  0x9d   : > { %v882_v61 = vpop.permute.xlu0 %881 }
  0xd0   : > { %v5843_v15 = vpop.f32.mrf.mxu0 }
  0xd1   : > { %v482_v16 = vadd.f32 %v5843_v15, %v5403_v14 }
  0xd2   : > { %v476_v17 = vpop.f32.mrf.mxu0 }
  0xd3   : > { %v477_v18 = vadd.f32 %v5403_v14, %v476_v17  ;;  %v516_v20 = vmax.f32 %v482_v16, 0.0 }
  0xd4   : > { %v5846_v23 = vpop.f32.mrf.mxu0 }
  0xd5   : > { %v515_v19 = vmax.f32 %v477_v18, 0.0  ;;  %v492_v26 = vadd.f32 %v5846_v23, %v5403_v14  ;;  %v820_v23 = vsub.f32 1.0, %v6387_v22 }
  0xd6   : > { %v486_v27 = vpop.f32.mrf.mxu0 }
  0xd7   : > { %5859 = vmatprep.mubr.msk.f32.mxu1 %vm533_vm2, %v515_v19  ;;  %v487_v28 = vadd.f32 %v5403_v14, %v486_v27  ;;  %v518_v30 = vmax.f32 %v492_v26, 0.0  ;;  %v6396_v27 = vld [vmem:[%s6904_s8] sm:$0xff] }
  0xd8   : > { %5860 = vmatmul.mubr.msk.f32.vlgmr.msra.gmra.mxu1 %vm533_vm2, %v516_v20  ;;  %v5849_v31 = vpop.f32.mrf.mxu0 }
  0xd9   : > { %v517_v32 = vmax.f32 %v487_v28, 0.0  ;;  %v502_v33 = vadd.f32 %v5849_v31, %v5403_v14  ;;  %v6413_v31 = vld [vmem:[%s6904_s8 + $0x10] sm:$0xff] }
  0xda   : > { %v496_v34 = vpop.f32.mrf.mxu0 }
  0xdb   : > { %v497_v36 = vadd.f32 %v5403_v14, %v496_v34  ;;  %5862 = vmatprep.mubr.msk.f32.mxu1 %vm533_vm2, %v517_v32  ;;  %v520_v37 = vmax.f32 %v502_v33, 0.0  ;;  %v5437_v32 = vld [vmem:[%s6904_s8 + $0x18] sm:$0x1f]  ;;  %v1181_v33 = vld [vmem:[%s6905_s9 + $0x8] sm:$0x1f]  ;;  %v6430_v34 = vld [vmem:[%s6905_s9 + $0x10] sm:$0xff] }
  0xdc   : > { %v5852_v38 = vpop.f32.mrf.mxu0  ;;  %5863 = vmatmul.mubr.msk.f32.gmra.mxu1 %vm533_vm2, %v518_v30  ;;  %v1094_v30 = vld [vmem:[%s6904_s8 + $0x8] sm:$0x1f] }
  0xdd   : > { %v519_v39 = vmax.f32 %v497_v36, 0.0  ;;  %v512_v40 = vadd.f32 %v5852_v38, %v5403_v14 }
  0xde   : > { %v506_v41 = vpop.f32.mrf.mxu0 }
  0xdf   : > { %v507_v42 = vadd.f32 %v5403_v14, %v506_v41  ;;  %5865 = vmatprep.mubr.msk.f32.mxu1 %vm533_vm2, %v519_v39  ;;  %v522_v43 = vmax.f32 %v512_v40, 0.0 }
  0xe0   : > { %5866 = vmatmul.mubr.msk.f32.gmra.mxu1 %vm533_vm2, %v520_v37 }
  0xe1   : > { %v521_v44 = vmax.f32 %v507_v42, 0.0 }
  0xe3   : > { %5868 = vmatprep.mubr.msk.f32.mxu1 %vm533_vm2, %v521_v44 }
  0xe4   : > { %5869 = vmatmul.mubr.msk.f32.gmra.mxu1 %vm533_vm2, %v522_v43 }
 0x198   : > { %v5861_v46 = vpop.f32.mrf.mxu1 }
 0x199   : > { %v630_v47 = vadd.f32 %v5861_v46, %v5413_v45 }
 0x19a   : > { %v624_v48 = vpop.f32.mrf.mxu1 }
 0x19b   : > { %v625_v49 = vadd.f32 %v5413_v45, %v624_v48  ;;  %v664_v51 = vmax.f32 %v630_v47, 0.0 }
 0x19c   : > { %v5864_v0 = vpop.f32.mrf.mxu1 }
 0x19d   : > { %v663_v50 = vmax.f32 %v625_v49, 0.0  ;;  %v640_v1 = vadd.f32 %v5864_v0, %v5413_v45 }
 0x19e   : > { %v634_v3 = vpop.f32.mrf.mxu1 }
 0x19f   : > { %5877 = vmatprep.mubr.msk.f32.mxu0 %vm533_vm2, %v663_v50  ;;  %v635_v4 = vadd.f32 %v5413_v45, %v634_v3  ;;  %v666_v5 = vmax.f32 %v640_v1, 0.0 }
 0x1a0   : > { %5878 = vmatmul.mubr.msk.f32.vlgmr.msra.gmra.mxu0 %vm533_vm2, %v664_v51  ;;  %v5867_v6 = vpop.f32.mrf.mxu1 }
 0x1a1   : > { %v665_v7 = vmax.f32 %v635_v4, 0.0  ;;  %v650_v8 = vadd.f32 %v5867_v6, %v5413_v45 }
 0x1a2   : > { %v644_v9 = vpop.f32.mrf.mxu1 }
 0x1a3   : > { %v645_v10 = vadd.f32 %v5413_v45, %v644_v9  ;;  %5880 = vmatprep.mubr.msk.f32.mxu0 %vm533_vm2, %v665_v7  ;;  %v668_v11 = vmax.f32 %v650_v8, 0.0  ;;  %v6484_v8 = vld [vmem:[%s6904_s8 + $0x20] sm:$0xff]  ;;  %v6489_v9 = vld [vmem:[%s6904_s8 + $0x30] sm:$0xff] }
 0x1a4   : > { %v5870_v12 = vpop.f32.mrf.mxu1  ;;  %5881 = vmatmul.mubr.msk.f32.gmra.mxu0 %vm533_vm2, %v666_v5 }
 0x1a5   : > { %v667_v13 = vmax.f32 %v645_v10, 0.0  ;;  %v660_v14 = vadd.f32 %v5870_v12, %v5413_v45 }
 0x1a6   : > { %v654_v15 = vpop.f32.mrf.mxu1 }
 0x1a7   : > { %v655_v16 = vadd.f32 %v5413_v45, %v654_v15  ;;  %5883 = vmatprep.mubr.msk.f32.mxu0 %vm533_vm2, %v667_v13  ;;  %v670_v17 = vmax.f32 %v660_v14, 0.0  ;;  %v6503_v14 = vld [vmem:[%s6897_s1 + $0x20] sm:$0xff] }
 0x1a8   : > { %5884 = vmatmul.mubr.msk.f32.gmra.mxu0 %vm533_vm2, %v668_v11 }
 0x1a9   : > { %v669_v18 = vmax.f32 %v655_v16, 0.0  ;;  %v5455_v16 = vld [vmem:[%s6904_s8 + $0x28] sm:$0x1f] }
 0x1ab   : > { %5886 = vmatprep.mubr.msk.f32.mxu0 %vm533_vm2, %v669_v18  ;;  %v5460_v18 = vld [vmem:[%s6905_s9 + $0x28] sm:$0x1f] }
 0x1ac   : > { %5887 = vmatmul.mubr.msk.f32.gmra.mxu0 %vm533_vm2, %v670_v17  ;;  %v5462_v17 = vld [vmem:[%s6904_s8 + $0x38] sm:$0x1f] }
 0x260   : > { %v5879_v56 = vpop.f32.mrf.mxu0 }
 0x261   : > { %v777_v57 = vadd.f32 %v5879_v56, %v6365_v55 }
 0x262   : > { %v771_v58 = vpop.f32.mrf.mxu0 }
 0x263   : > { %v867_v59 = vmul.f32 %v834_v54, %v777_v57  ;;  %v772_v60 = vadd.f32 %v6365_v55, %v771_v58  ;;  %v813_v58 = vld [vmem:[%s6897_s1 + $0x18] sm:$0xff] }
 0x264   : > { %v5882_v40 = vpop.f32.mrf.mxu0 }
 0x265   : > { %v915_v62 = vadd.f32 %v882_v61, %v867_v59  ;;  %v866_v63 = vmul.f32 %v829_v52, %v772_v60  ;;  %v821_v59 = vsub.f32 1.0, %v813_v58  ;;  %v787_v4 = vadd.f32 %v5882_v40, %v6365_v55 }
 0x266   : > { %v781_v41 = vpop.f32.mrf.mxu0 }
 0x267   : > { %940 = vrot.lane.b32.xlu0 %v915_v62, %s6231_s26  ;;  %v914_v2 = vadd.f32 %v877_v53, %v866_v63  ;;  %v782_v62 = vadd.f32 %v6365_v55, %v781_v41 }
 0x268   : > { %v6449_v42 = vpop.f32.mrf.mxu0 }
 0x269   : > { %938 = vrot.lane.b32.xlu1 %v914_v2, %s6231_s26 }
 0x26a   : > { %v6451_v43 = vpop.f32.mrf.mxu0 }
 0x26c   : > { %v6453_v44 = vpop.f32.mrf.mxu0 }
 0x26e   : > { %v6455_v45 = vpop.f32.mrf.mxu0 }
 0x2d9   : > { %v941_v19 = vpop.permute.xlu0 %940 }
 0x2da   : > { %964 = vst.msk [vmem:[#allocation2 + $0x8] sm:$0xff] %vm962_vm3, %v941_v19  ;;  %v822_v19 = vsub.f32 1.0, %v6503_v14 }
 0x2db   : > { %v939_v20 = vpop.permute.xlu1 %938 }
 0x2dc   : > { %963 = vst.msk [vmem:[#allocation2] sm:$0xff] %vm962_vm3, %v939_v20  ;;  %v6524_v20 = vld [vmem:[%s6905_s9 + $0x20] sm:$0xff] }
 0x2e1   : > { %v6459_v52 = vld [vmem:[#allocation2 + $0x8] sm:$0xff] }
 0x2e3   : > { %v6379_v21 = vld [vmem:[#allocation2] sm:$0xff] }
 0x2e4   : > { %979 = vxpose.xlu1.b32.start.end [1/1] (short) (narrow) %v6379_v21, 16  ;;  %5889 = vmatprep.subr.mxu1 %v6379_v21 }
 0x2e5   : > { %5890 = vmatpush3.msra.mxu1 %v6379_v21 }
 0x302   : > { %6221 = vset.pattern.permute.xlu1 %v6230_v24  ;;  %v5442_v24 = vld [vmem:[%s6905_s9 + $0x18] sm:$0x1f] }
 0x303   : > { %5908 = vmatprep.subr.msk.mxu0 %vm406_vm0, %v5442_v24 }
 0x304   : > { %5909 = vmatpush3.msk.msra.mxu0 %vm406_vm0, %v5442_v24 }
 0x305   : > { %5910 = vmatprep.subr.mxu0 %v6430_v34 }
 0x306   : > { %838 = vperm.xlu1 %6221, %v820_v23   ;;  %5911 = vmatpush3.msra.mxu0 %v6430_v34 }
 0x360   : > { %v995_v25 = vpop.trf.xlu1 }
 0x361   : > { %5891 = vmatprep.mubr.msk.f32.mxu1 %vm1011_vm4, %v995_v25 }
 0x364   : > { %v996_v26 = vpop.trf.xlu1 }
 0x365   : > { %5892 = vmatmul.mubr.msk.f32.vlgmr.msra.gmra.mxu1 %vm1011_vm4, %v996_v26 }
 0x366   : > { %5898 = vmatprep.mubr.msk.f32.mxu1 %vm1095_vm5, %v6396_v27 }
 0x381   : > { %v839_v63 = vpop.permute.xlu1 %838 }
 0x382   : > { %v868_v0 = vmul.f32 %v839_v63, %v782_v62 }
 0x425   : > { %v5893_v28 = vpop.f32.mrf.mxu1 }
 0x426   : > { %5894 = vmatprep.subr.msk.mxu1 %vm406_vm0, %v5893_v28 }
 0x427   : > { %v1084_v29 = vpop.f32.mrf.mxu1  ;;  %5895 = vmatpush3.msk.msra.mxu1 %vm406_vm0, %v5893_v28 }
 0x428   : > { %5896 = vmatprep.subr.mxu1 %v1084_v29 }
 0x429   : > { %5897 = vmatpush3.msra.mxu1 %v1084_v29 }
 0x42a   : > { %5899 = vmatmul.mubr.msk.f32.vlgmr.msra.gmra.mxu1 %vm1095_vm5, %v1094_v30  ;;  %5901 = vmatprep.subr.msk.mxu1 %vm406_vm0, %v5893_v28 }
 0x42b   : > { %5902 = vmatpush3.msk.msra.mxu1 %vm406_vm0, %v5893_v28  ;;  %5905 = vmatprep.mubr.msk.f32.mxu1 %vm1095_vm5, %v6413_v31 }
 0x42c   : > { %5903 = vmatprep.subr.mxu1 %v1084_v29 }
 0x42d   : > { %5904 = vmatpush3.msra.mxu1 %v1084_v29 }
 0x42e   : > { %5906 = vmatmul.mubr.msk.f32.vlgmr.msra.gmra.mxu1 %vm1095_vm5, %v5437_v32  ;;  %5915 = vmatprep.subr.msk.mxu1 %vm406_vm0, %v1181_v33 }
 0x42f   : > { %5916 = vmatpush3.msk.msra.mxu1 %vm406_vm0, %v1181_v33 }
 0x430   : > { %5917 = vmatprep.subr.mxu1 %v6438_v35 }
 0x431   : > { %5918 = vmatpush3.msra.mxu1 %v6438_v35 }
 0x4ea   : > { %v5900_v36 = vpop.f32.mrf.mxu1 }
 0x4ec   : > { %v1171_v37 = vpop.f32.mrf.mxu1 }
 0x4ed   : > { %5919 = vmatprep.mubr.msk.f32.mxu1 %vm1095_vm5, %v1171_v37 }
 0x4ee   : > { %v5907_v38 = vpop.f32.mrf.mxu1  ;;  %5920 = vmatmul.mubr.msk.f32.vlgmr.msra.gmra.mxu1 %vm1095_vm5, %v5900_v36 }
 0x4f0   : > { %v1257_v39 = vpop.f32.mrf.mxu1 }
 0x4f1   : > { %5912 = vmatprep.mubr.msk.f32.mxu0 %vm1095_vm5, %v1257_v39 }
 0x4f2   : > { %5913 = vmatmul.mubr.msk.f32.vlgmr.msra.gmra.mxu0 %vm1095_vm5, %v5907_v38 }
 0x4f3   : > { %5926 = vmatprep.mubr.msk.f32.mxu0 %vm1095_vm5, %v6379_v21 }
 0x5ae   : > { %v5921_v46 = vpop.f32.mrf.mxu1 }
 0x5b0   : > { %v1428_v49 = vpop.f32.mrf.mxu1 }
 0x5b2   : > { %v5914_v47 = vpop.f32.mrf.mxu0 }
 0x5b3   : > { %v1434_v48 = vadd.f32 %v5921_v46, %v5914_v47  ;;  %v5483_v47 = vld [vmem:[%s6904_s8 + $0x18] sm:$0x1f] }
 0x5b4   : > { %v1344_v50 = vpop.f32.mrf.mxu0 }
 0x5b5   : > { %v1429_v51 = vadd.f32 %v1428_v49, %v1344_v50  ;;  %5922 = vmatprep.subr.msk.mxu0 %vm406_vm0, %v1434_v48  ;;  %v5488_v49 = vld [vmem:[%s6905_s9 + $0x18] sm:$0x1f]  ;;  %v2274_v50 = vld [vmem:[%s6905_s9 + $0x8] sm:$0x1f] }
 0x5b6   : > { %5923 = vmatpush3.msk.msra.mxu0 %vm406_vm0, %v1434_v48  ;;  %v2188_v48 = vld [vmem:[%s6904_s8 + $0x8] sm:$0x1f] }
 0x5b7   : > { %5924 = vmatprep.subr.mxu0 %v1429_v51 }
 0x5b8   : > { %5925 = vmatpush3.msra.mxu0 %v1429_v51 }
 0x5b9   : > { %5927 = vmatmul.mubr.msk.f32.vlgmr.msra.gmra.mxu0 %vm1095_vm5, %v6459_v52 }
 0x5ba   : > { %5938 = vmatprep.mubr.msk.f32.mxu0 %vm1095_vm5, %v6484_v8 }
 0x679   : > { %v6463_v53 = vpop.f32.mrf.mxu0 }
 0x67a   : > { %v1522_v33 = vmul.f32 0.125, %v6463_v53 }
 0x67b   : > { %v1512_v54 = vpop.f32.mrf.mxu0 }
 0x67c   : > { %v1521_v56 = vmul.f32 0.125, %v1512_v54  ;;  %v1524_v41 = vadd.f32 %v1522_v33, %v6459_v52  ;;  %v5501_v33 = vld [vmem:[%s6904_s8 + $0x28] sm:$0x1f] }
 0x67e   : > { %v6466_v57 = vadd.f32 %v1521_v56, %v6379_v21  ;;  %v5467_v21 = vld [vmem:[%s6905_s9 + $0x38] sm:$0x1f] }
 0x680   : > { %1525 = vxpose.xlu0.b32.start.end [1/1] (short) (narrow) %v6466_v57, 16  ;;  %5929 = vmatprep.subr.mxu1 %v6466_v57 }
 0x681   : > { %5930 = vmatpush3.msra.mxu1 %v6466_v57 }
 0x6ad   : > { %886 = vperm.xlu0 %6220, %v6387_v22   ;;  %v6539_v22 = vld [vmem:[%s6905_s9 + $0x30] sm:$0xff] }
 0x6b1   : > { %843 = vperm.xlu0 %6220, %v821_v59  }
 0x6b5   : > { %891 = vperm.xlu0 %6220, %v813_v58  }
 0x6fc   : > { %v1541_v60 = vpop.trf.xlu0 }
 0x6fd   : > { %5931 = vmatprep.mubr.msk.f32.mxu1 %vm1011_vm4, %v1541_v60 }
 0x700   : > { %v1542_v61 = vpop.trf.xlu0 }
 0x701   : > { %5932 = vmatmul.mubr.msk.f32.vlgmr.msra.gmra.mxu1 %vm1011_vm4, %v1542_v61 }
 0x702   : > { %5945 = vmatprep.mubr.msk.f32.mxu1 %vm1095_vm5, %v6489_v9 }
 0x728   : > { %v887_v1 = vpop.permute.xlu0 %886 }
 0x729   : > { %v916_v2 = vadd.f32 %v887_v1, %v868_v0 }
 0x72b   : > { %942 = vrot.lane.b32.xlu1 %v916_v2, %s6231_s26 }
 0x72c   : > { %v844_v3 = vpop.permute.xlu0 %843 }
 0x72d   : > { %v869_v5 = vmul.f32 %v844_v3, %v787_v4 }
 0x730   : > { %v892_v6 = vpop.permute.xlu0 %891 }
 0x731   : > { %v917_v7 = vadd.f32 %v892_v6, %v869_v5 }
 0x733   : > { %944 = vrot.lane.b32.xlu0 %v917_v7, %s6231_s26 }
 0x79d   : > { %v943_v10 = vpop.permute.xlu1 %942 }
 0x79e   : > { %965 = vst.msk [vmem:[#allocation2 + $0x10] sm:$0xff] %vm962_vm3, %v943_v10 }
 0x7a5   : > { %v945_v11 = vpop.permute.xlu0 %944  ;;  %v6496_v12 = vld [vmem:[#allocation2 + $0x10] sm:$0xff] }
 0x7a6   : > { %966 = vst.msk [vmem:[#allocation2 + $0x18] sm:$0xff] %vm962_vm3, %v945_v11  ;;  %2074 = vxpose.xlu1.b32.start.end [1/1] (short) (narrow) %v6496_v12, 16  ;;  %v815_v11 = vld [vmem:[%s6897_s1 + $0x28] sm:$0xff] }
 0x7ad   : > { %v6607_v4 = vld [vmem:[#allocation2 + $0x18] sm:$0xff] }
 0x7c1   : > { %v5933_v13 = vpop.f32.mrf.mxu1 }
 0x7c2   : > { %5934 = vmatprep.subr.msk.mxu0 %vm406_vm0, %v5933_v13  ;;  %5941 = vmatprep.subr.msk.mxu1 %vm406_vm0, %v5933_v13 }
 0x7c3   : > { %v1629_v15 = vpop.f32.mrf.mxu1  ;;  %5935 = vmatpush3.msk.msra.mxu0 %vm406_vm0, %v5933_v13  ;;  %5942 = vmatpush3.msk.msra.mxu1 %vm406_vm0, %v5933_v13  ;;  %v823_v13 = vsub.f32 1.0, %v815_v11 }
 0x7c4   : > { %5936 = vmatprep.subr.mxu0 %v1629_v15  ;;  %5943 = vmatprep.subr.mxu1 %v1629_v15 }
 0x7c5   : > { %5937 = vmatpush3.msra.mxu0 %v1629_v15  ;;  %5944 = vmatpush3.msra.mxu1 %v1629_v15 }
 0x7c6   : > { %5939 = vmatmul.mubr.msk.f32.vlgmr.msra.gmra.mxu0 %vm1095_vm5, %v5455_v16  ;;  %5946 = vmatmul.mubr.msk.f32.vlgmr.msra.gmra.mxu1 %vm1095_vm5, %v5462_v17  ;;  %v792_v17 = vadd.f32 %v6365_v55, %v6451_v43 }
 0x7c7   : > { %5955 = vmatprep.subr.msk.mxu1 %vm406_vm0, %v5460_v18  ;;  %5948 = vmatprep.subr.msk.mxu0 %vm406_vm0, %v5467_v21 }
 0x7c8   : > { %5956 = vmatpush3.msk.msra.mxu1 %vm406_vm0, %v5460_v18  ;;  %848 = vperm.xlu1 %6221, %v822_v19  }
 0x7c9   : > { %5957 = vmatprep.subr.mxu1 %v6524_v20  ;;  %5949 = vmatpush3.msk.msra.mxu0 %vm406_vm0, %v5467_v21 }
 0x7ca   : > { %5958 = vmatpush3.msra.mxu1 %v6524_v20  ;;  %5950 = vmatprep.subr.mxu0 %v6539_v22 }
 0x7cb   : > { %5969 = vmatprep.subr.mxu1 %v6496_v12  ;;  %5951 = vmatpush3.msra.mxu0 %v6539_v22 }
 0x822   : > { %v2090_v26 = vpop.trf.xlu1 }
 0x826   : > { %v2091_v29 = vpop.trf.xlu1 }
 0x843   : > { %v849_v16 = vpop.permute.xlu1 %848 }
 0x844   : > { %v870_v18 = vmul.f32 %v849_v16, %v792_v17 }
 0x886   : > { %v5940_v23 = vpop.f32.mrf.mxu0  ;;  %v5947_v25 = vpop.f32.mrf.mxu1 }
 0x888   : > { %v1716_v24 = vpop.f32.mrf.mxu0  ;;  %v1803_v28 = vpop.f32.mrf.mxu1 }
 0x889   : > { %5952 = vmatprep.mubr.msk.f32.mxu0 %vm1095_vm5, %v1803_v28  ;;  %5959 = vmatprep.mubr.msk.f32.mxu1 %vm1095_vm5, %v1716_v24 }
 0x88a   : > { %5953 = vmatmul.mubr.msk.f32.vlgmr.msra.gmra.mxu0 %vm1095_vm5, %v5947_v25  ;;  %5960 = vmatmul.mubr.msk.f32.vlgmr.msra.gmra.mxu1 %vm1095_vm5, %v5940_v23  ;;  %v797_v23 = vadd.f32 %v6449_v42, %v6365_v55  ;;  %v6643_v42 = vld [vmem:[%s6897_s1 + $0x30] sm:$0xff] }
 0x88b   : > { %5970 = vmatpush3.msra.mxu1 %v6496_v12  ;;  %5966 = vmatprep.mubr.msk.f32.mxu0 %vm1095_vm5, %v6466_v57 }
 0x88c   : > { %5971 = vmatprep.mubr.msk.f32.mxu1 %vm1011_vm4, %v2090_v26 }
 0x88e   : > { %5972 = vmatmul.mubr.msk.f32.vlgmr.msra.gmra.mxu1 %vm1011_vm4, %v2091_v29 }
 0x88f   : > { %5985 = vmatprep.mubr.msk.f32.mxu1 %vm1095_vm5, %v6413_v31 }
 0x94a   : > { %v5954_v30 = vpop.f32.mrf.mxu0  ;;  %v5961_v32 = vpop.f32.mrf.mxu1 }
 0x94b   : > { %v1980_v36 = vadd.f32 %v5961_v32, %v5954_v30 }
 0x94c   : > { %v1890_v37 = vpop.f32.mrf.mxu0  ;;  %v1974_v38 = vpop.f32.mrf.mxu1 }
 0x94d   : > { %v1975_v39 = vadd.f32 %v1974_v38, %v1890_v37  ;;  %5962 = vmatprep.subr.msk.mxu0 %vm406_vm0, %v1980_v36  ;;  %v5506_v37 = vld [vmem:[%s6905_s9 + $0x28] sm:$0x1f]  ;;  %v824_v38 = vsub.f32 1.0, %v6643_v42 }
 0x94e   : > { %5963 = vmatpush3.msk.msra.mxu0 %vm406_vm0, %v1980_v36  ;;  %v5973_v40 = vpop.f32.mrf.mxu1  ;;  %v5508_v36 = vld [vmem:[%s6904_s8 + $0x38] sm:$0x1f] }
 0x94f   : > { %5964 = vmatprep.subr.mxu0 %v1975_v39  ;;  %5981 = vmatprep.subr.msk.mxu1 %vm406_vm0, %v5973_v40 }
 0x950   : > { %5965 = vmatpush3.msra.mxu0 %v1975_v39  ;;  %v2178_v46 = vpop.f32.mrf.mxu1  ;;  %5982 = vmatpush3.msk.msra.mxu1 %vm406_vm0, %v5973_v40  ;;  %v5513_v39 = vld [vmem:[%s6905_s9 + $0x38] sm:$0x1f] }
 0x951   : > { %5967 = vmatmul.mubr.msk.f32.vlgmr.msra.gmra.mxu0 %vm1095_vm5, %v1524_v41  ;;  %5974 = vmatprep.subr.msk.mxu0 %vm406_vm0, %v5973_v40 }
 0x952   : > { %5983 = vmatprep.subr.mxu1 %v2178_v46  ;;  %5975 = vmatpush3.msk.msra.mxu0 %vm406_vm0, %v5973_v40 }
 0x953   : > { %5984 = vmatpush3.msra.mxu1 %v2178_v46  ;;  %5976 = vmatprep.subr.mxu0 %v2178_v46 }
 0x954   : > { %5986 = vmatmul.mubr.msk.f32.vlgmr.msra.gmra.mxu1 %vm1095_vm5, %v5483_v47  ;;  %5977 = vmatpush3.msra.mxu0 %v2178_v46 }
 0x955   : > { %5978 = vmatprep.mubr.msk.f32.mxu0 %vm1095_vm5, %v6396_v27  ;;  %5988 = vmatprep.subr.msk.mxu0 %vm406_vm0, %v5488_v49 }
 0x956   : > { %5979 = vmatmul.mubr.msk.f32.vlgmr.msra.gmra.mxu0 %vm1095_vm5, %v2188_v48  ;;  %5995 = vmatprep.subr.msk.mxu1 %vm406_vm0, %v2274_v50 }
 0x957   : > { %5989 = vmatpush3.msk.msra.mxu0 %vm406_vm0, %v5488_v49  ;;  %5996 = vmatpush3.msk.msra.mxu1 %vm406_vm0, %v2274_v50 }
 0x958   : > { %5990 = vmatprep.subr.mxu0 %v6430_v34  ;;  %5997 = vmatprep.subr.mxu1 %v6438_v35 }
 0x959   : > { %5991 = vmatpush3.msra.mxu0 %v6430_v34  ;;  %5998 = vmatpush3.msra.mxu1 %v6438_v35 }
 0xa11   : > { %v5968_v51 = vpop.f32.mrf.mxu0 }
 0xa12   : > { %v2068_v52 = vmul.f32 0.125, %v5968_v51 }
 0xa13   : > { %v2058_v53 = vpop.f32.mrf.mxu0 }
 0xa14   : > { %v2070_v54 = vadd.f32 %v2068_v52, %v1524_v41  ;;  %v2067_v56 = vmul.f32 0.125, %v2058_v53  ;;  %v5987_v58 = vpop.f32.mrf.mxu1 }
 0xa16   : > { %2073 = vst.msk [vmem:[%s6592_s25 + $0x8] sm:$0x1] %vm2072_vm6, %v2070_v54  ;;  %v2069_v59 = vadd.f32 %v2067_v56, %v6466_v57  ;;  %v5980_v60 = vpop.f32.mrf.mxu0  ;;  %v2349_v61 = vpop.f32.mrf.mxu1 }
 0xa17   : > { %5992 = vmatprep.mubr.msk.f32.mxu0 %vm1095_vm5, %v2349_v61 }
 0xa18   : > { %2071 = vst.msk [vmem:[%s6592_s25] sm:$0xff] %vm1095_vm5, %v2069_v59  ;;  %v2264_v62 = vpop.f32.mrf.mxu0  ;;  %5993 = vmatmul.mubr.msk.f32.vlgmr.msra.gmra.mxu0 %vm1095_vm5, %v5987_v58 }
 0xa19   : > { %5999 = vmatprep.mubr.msk.f32.mxu1 %vm1095_vm5, %v2264_v62  ;;  %6006 = vmatprep.mubr.msk.f32.mxu0 %vm1095_vm5, %v6496_v12  ;;  %v5531_v62 = vld [vmem:[%s6904_s8 + $0x18] sm:$0x1f] }
 0xa1a   : > { %6000 = vmatmul.mubr.msk.f32.vlgmr.msra.gmra.mxu1 %vm1095_vm5, %v5980_v60 }
 0xad8   : > { %v5994_v63 = vpop.f32.mrf.mxu0 }
 0xada   : > { %v6001_v0 = vpop.f32.mrf.mxu1  ;;  %v2435_v57 = vpop.f32.mrf.mxu0 }
 0xadb   : > { %v2525_v1 = vadd.f32 %v6001_v0, %v5994_v63  ;;  %v3275_v63 = vld [vmem:[%s6904_s8 + $0x8] sm:$0x1f]  ;;  %v5536_v0 = vld [vmem:[%s6905_s9 + $0x18] sm:$0x1f] }
 0xadc   : > { %v2519_v2 = vpop.f32.mrf.mxu1 }
 0xadd   : > { %v2520_v3 = vadd.f32 %v2519_v2, %v2435_v57  ;;  %6002 = vmatprep.subr.msk.mxu0 %vm406_vm0, %v2525_v1 }
 0xade   : > { %6003 = vmatpush3.msk.msra.mxu0 %vm406_vm0, %v2525_v1  ;;  %v3361_v1 = vld [vmem:[%s6905_s9 + $0x8] sm:$0x1f] }
 0xadf   : > { %6004 = vmatprep.subr.mxu0 %v2520_v3 }
 0xae0   : > { %6005 = vmatpush3.msra.mxu0 %v2520_v3 }
 0xae1   : > { %6007 = vmatmul.mubr.msk.f32.vlgmr.msra.gmra.mxu0 %vm1095_vm5, %v6607_v4 }
 0xae2   : > { %6018 = vmatprep.mubr.msk.f32.mxu0 %vm1095_vm5, %v6484_v8 }
 0xba1   : > { %v6613_v5 = vpop.f32.mrf.mxu0 }
 0xba2   : > { %v2613_v52 = vmul.f32 0.125, %v6613_v5 }
 0xba3   : > { %v2603_v6 = vpop.f32.mrf.mxu0 }
 0xba4   : > { %v2612_v7 = vmul.f32 0.125, %v2603_v6  ;;  %v2615_v60 = vadd.f32 %v2613_v52, %v6607_v4 }
 0xba6   : > { %v6616_v10 = vadd.f32 %v2612_v7, %v6496_v12 }
 0xba8   : > { %2616 = vxpose.xlu0.b32.start.end [1/1] (short) (narrow) %v6616_v10, 16  ;;  %6009 = vmatprep.subr.mxu1 %v6616_v10 }
 0xba9   : > { %6010 = vmatpush3.msra.mxu1 %v6616_v10 }
 0xbd5   : > { %896 = vperm.xlu0 %6220, %v6503_v14  }
 0xbd9   : > { %853 = vperm.xlu0 %6220, %v823_v13  }
 0xbdd   : > { %901 = vperm.xlu0 %6220, %v815_v11  }
 0xc24   : > { %v2632_v15 = vpop.trf.xlu0 }
 0xc25   : > { %6011 = vmatprep.mubr.msk.f32.mxu1 %vm1011_vm4, %v2632_v15 }
 0xc28   : > { %v2633_v12 = vpop.trf.xlu0 }
 0xc29   : > { %6012 = vmatmul.mubr.msk.f32.vlgmr.msra.gmra.mxu1 %vm1011_vm4, %v2633_v12 }
 0xc2a   : > { %6025 = vmatprep.mubr.msk.f32.mxu1 %vm1095_vm5, %v6489_v9 }
 0xc50   : > { %v897_v19 = vpop.permute.xlu0 %896 }
 0xc51   : > { %v918_v21 = vadd.f32 %v897_v19, %v870_v18 }
 0xc53   : > { %946 = vrot.lane.b32.xlu1 %v918_v21, %s6231_s26 }
 0xc54   : > { %v854_v14 = vpop.permute.xlu0 %853 }
 0xc55   : > { %v871_v25 = vmul.f32 %v854_v14, %v797_v23 }
 0xc58   : > { %v902_v26 = vpop.permute.xlu0 %901 }
 0xc59   : > { %v919_v24 = vadd.f32 %v902_v26, %v871_v25 }
 0xc5b   : > { %948 = vrot.lane.b32.xlu0 %v919_v24, %s6231_s26  ;;  %v817_v24 = vld [vmem:[%s6897_s1 + $0x38] sm:$0xff] }
 0xcc5   : > { %v947_v28 = vpop.permute.xlu1 %946 }
 0xcc6   : > { %967 = vst.msk [vmem:[#allocation2 + $0x20] sm:$0xff] %vm962_vm3, %v947_v28  ;;  %v825_v28 = vsub.f32 1.0, %v817_v24 }
 0xccd   : > { %v949_v29 = vpop.permute.xlu0 %948  ;;  %v6636_v30 = vld [vmem:[#allocation2 + $0x20] sm:$0xff] }
 0xcce   : > { %968 = vst.msk [vmem:[#allocation2 + $0x28] sm:$0xff] %vm962_vm3, %v949_v29  ;;  %3161 = vxpose.xlu1.b32.start.end [1/1] (short) (narrow) %v6636_v30, 16 }
 0xcd5   : > { %v6730_v21 = vld [vmem:[#allocation2 + $0x28] sm:$0xff] }
 0xce9   : > { %v6013_v43 = vpop.f32.mrf.mxu1 }
 0xcea   : > { %6014 = vmatprep.subr.msk.mxu0 %vm406_vm0, %v6013_v43  ;;  %6021 = vmatprep.subr.msk.mxu1 %vm406_vm0, %v6013_v43 }
 0xceb   : > { %v2720_v32 = vpop.f32.mrf.mxu1  ;;  %6015 = vmatpush3.msk.msra.mxu0 %vm406_vm0, %v6013_v43  ;;  %6022 = vmatpush3.msk.msra.mxu1 %vm406_vm0, %v6013_v43 }
 0xcec   : > { %6016 = vmatprep.subr.mxu0 %v2720_v32  ;;  %6023 = vmatprep.subr.mxu1 %v2720_v32 }
 0xced   : > { %6017 = vmatpush3.msra.mxu0 %v2720_v32  ;;  %6024 = vmatpush3.msra.mxu1 %v2720_v32  ;;  %v802_v32 = vadd.f32 %v6365_v55, %v6455_v45 }
 0xcee   : > { %6019 = vmatmul.mubr.msk.f32.vlgmr.msra.gmra.mxu0 %vm1095_vm5, %v5501_v33  ;;  %6026 = vmatmul.mubr.msk.f32.vlgmr.msra.gmra.mxu1 %vm1095_vm5, %v5508_v36 }
 0xcef   : > { %6035 = vmatprep.subr.msk.mxu1 %vm406_vm0, %v5506_v37  ;;  %6028 = vmatprep.subr.msk.mxu0 %vm406_vm0, %v5513_v39 }
 0xcf0   : > { %6036 = vmatpush3.msk.msra.mxu1 %vm406_vm0, %v5506_v37  ;;  %858 = vperm.xlu1 %6221, %v824_v38   ;;  %v807_v38 = vadd.f32 %v6453_v44, %v6365_v55  ;;  %v5549_v44 = vld [vmem:[%s6904_s8 + $0x28] sm:$0x1f] }
 0xcf1   : > { %6037 = vmatprep.subr.mxu1 %v6524_v20  ;;  %6029 = vmatpush3.msk.msra.mxu0 %vm406_vm0, %v5513_v39 }
 0xcf2   : > { %6038 = vmatpush3.msra.mxu1 %v6524_v20  ;;  %6030 = vmatprep.subr.mxu0 %v6539_v22 }
 0xcf3   : > { %6049 = vmatprep.subr.mxu1 %v6636_v30  ;;  %6031 = vmatpush3.msra.mxu0 %v6539_v22 }
 0xd4a   : > { %v3177_v46 = vpop.trf.xlu1 }
 0xd4e   : > { %v3178_v49 = vpop.trf.xlu1 }
 0xd6b   : > { %v859_v43 = vpop.permute.xlu1 %858 }
 0xd6c   : > { %v872_v33 = vmul.f32 %v859_v43, %v802_v32 }
 0xdae   : > { %v6020_v40 = vpop.f32.mrf.mxu0  ;;  %v6027_v41 = vpop.f32.mrf.mxu1 }
 0xdb0   : > { %v2806_v47 = vpop.f32.mrf.mxu0  ;;  %v2891_v48 = vpop.f32.mrf.mxu1 }
 0xdb1   : > { %6032 = vmatprep.mubr.msk.f32.mxu0 %vm1095_vm5, %v2891_v48  ;;  %6039 = vmatprep.mubr.msk.f32.mxu1 %vm1095_vm5, %v2806_v47 }
 0xdb2   : > { %6033 = vmatmul.mubr.msk.f32.vlgmr.msra.gmra.mxu0 %vm1095_vm5, %v6027_v41  ;;  %6040 = vmatmul.mubr.msk.f32.vlgmr.msra.gmra.mxu1 %vm1095_vm5, %v6020_v40 }
 0xdb3   : > { %6050 = vmatpush3.msra.mxu1 %v6636_v30  ;;  %6046 = vmatprep.mubr.msk.f32.mxu0 %vm1095_vm5, %v6616_v10 }
 0xdb4   : > { %6051 = vmatprep.mubr.msk.f32.mxu1 %vm1011_vm4, %v3177_v46 }
 0xdb6   : > { %6052 = vmatmul.mubr.msk.f32.vlgmr.msra.gmra.mxu1 %vm1011_vm4, %v3178_v49  ;;  %v5556_v49 = vld [vmem:[%s6904_s8 + $0x38] sm:$0x1f] }
 0xdb7   : > { %6065 = vmatprep.mubr.msk.f32.mxu1 %vm1095_vm5, %v6413_v31 }
 0xe72   : > { %v6034_v50 = vpop.f32.mrf.mxu0  ;;  %v6041_v51 = vpop.f32.mrf.mxu1 }
 0xe73   : > { %v3067_v53 = vadd.f32 %v6041_v51, %v6034_v50  ;;  %v5554_v50 = vld [vmem:[%s6905_s9 + $0x28] sm:$0x1f]  ;;  %v5561_v51 = vld [vmem:[%s6905_s9 + $0x38] sm:$0x1f] }
 0xe74   : > { %v2977_v54 = vpop.f32.mrf.mxu0  ;;  %v3061_v56 = vpop.f32.mrf.mxu1 }
 0xe75   : > { %v3062_v58 = vadd.f32 %v3061_v56, %v2977_v54  ;;  %6042 = vmatprep.subr.msk.mxu0 %vm406_vm0, %v3067_v53 }
 0xe76   : > { %6043 = vmatpush3.msk.msra.mxu0 %vm406_vm0, %v3067_v53  ;;  %v6053_v59 = vpop.f32.mrf.mxu1 }
 0xe77   : > { %6044 = vmatprep.subr.mxu0 %v3062_v58  ;;  %6061 = vmatprep.subr.msk.mxu1 %vm406_vm0, %v6053_v59 }
 0xe78   : > { %6045 = vmatpush3.msra.mxu0 %v3062_v58  ;;  %v3265_v61 = vpop.f32.mrf.mxu1  ;;  %6062 = vmatpush3.msk.msra.mxu1 %vm406_vm0, %v6053_v59 }
 0xe79   : > { %6047 = vmatmul.mubr.msk.f32.vlgmr.msra.gmra.mxu0 %vm1095_vm5, %v2615_v60  ;;  %6054 = vmatprep.subr.msk.mxu0 %vm406_vm0, %v6053_v59 }
 0xe7a   : > { %6063 = vmatprep.subr.mxu1 %v3265_v61  ;;  %6055 = vmatpush3.msk.msra.mxu0 %vm406_vm0, %v6053_v59 }
 0xe7b   : > { %6064 = vmatpush3.msra.mxu1 %v3265_v61  ;;  %6056 = vmatprep.subr.mxu0 %v3265_v61 }
 0xe7c   : > { %6066 = vmatmul.mubr.msk.f32.vlgmr.msra.gmra.mxu1 %vm1095_vm5, %v5531_v62  ;;  %6057 = vmatpush3.msra.mxu0 %v3265_v61 }
 0xe7d   : > { %6058 = vmatprep.mubr.msk.f32.mxu0 %vm1095_vm5, %v6396_v27  ;;  %6068 = vmatprep.subr.msk.mxu0 %vm406_vm0, %v5536_v0 }
 0xe7e   : > { %6059 = vmatmul.mubr.msk.f32.vlgmr.msra.gmra.mxu0 %vm1095_vm5, %v3275_v63  ;;  %6075 = vmatprep.subr.msk.mxu1 %vm406_vm0, %v3361_v1 }
 0xe7f   : > { %6069 = vmatpush3.msk.msra.mxu0 %vm406_vm0, %v5536_v0  ;;  %6076 = vmatpush3.msk.msra.mxu1 %vm406_vm0, %v3361_v1 }
 0xe80   : > { %6070 = vmatprep.subr.mxu0 %v6430_v34  ;;  %6077 = vmatprep.subr.mxu1 %v6438_v35 }
 0xe81   : > { %6071 = vmatpush3.msra.mxu0 %v6430_v34  ;;  %6078 = vmatpush3.msra.mxu1 %v6438_v35 }
 0xf39   : > { %v6048_v57 = vpop.f32.mrf.mxu0 }
 0xf3a   : > { %v3155_v2 = vmul.f32 0.125, %v6048_v57 }
 0xf3b   : > { %v3145_v3 = vpop.f32.mrf.mxu0 }
 0xf3c   : > { %v3157_v4 = vadd.f32 %v3155_v2, %v2615_v60  ;;  %v3154_v5 = vmul.f32 0.125, %v3145_v3  ;;  %v6067_v6 = vpop.f32.mrf.mxu1 }
 0xf3e   : > { %5524 = vst.msk [vmem:[%s6592_s25 + $0x18] sm:$0x1] %vm2072_vm6, %v3157_v4  ;;  %v3156_v7 = vadd.f32 %v3154_v5, %v6616_v10  ;;  %v6060_v11 = vpop.f32.mrf.mxu0  ;;  %v3436_v13 = vpop.f32.mrf.mxu1  ;;  %v5579_v4 = vld [vmem:[%s6904_s8 + $0x18] sm:$0x1f]  ;;  %v4362_v5 = vld [vmem:[%s6904_s8 + $0x8] sm:$0x1f] }
 0xf3f   : > { %6072 = vmatprep.mubr.msk.f32.mxu0 %vm1095_vm5, %v3436_v13 }
 0xf40   : > { %5523 = vst.msk [vmem:[%s6592_s25 + $0x10] sm:$0xff] %vm1095_vm5, %v3156_v7  ;;  %v3351_v15 = vpop.f32.mrf.mxu0  ;;  %6073 = vmatmul.mubr.msk.f32.vlgmr.msra.gmra.mxu0 %vm1095_vm5, %v6067_v6  ;;  %v5584_v6 = vld [vmem:[%s6905_s9 + $0x18] sm:$0x1f]  ;;  %v4448_v7 = vld [vmem:[%s6905_s9 + $0x8] sm:$0x1f] }
 0xf41   : > { %6079 = vmatprep.mubr.msk.f32.mxu1 %vm1095_vm5, %v3351_v15  ;;  %6086 = vmatprep.mubr.msk.f32.mxu0 %vm1095_vm5, %v6636_v30 }
 0xf42   : > { %6080 = vmatmul.mubr.msk.f32.vlgmr.msra.gmra.mxu1 %vm1095_vm5, %v6060_v11 }
0x1000   : > { %v6074_v12 = vpop.f32.mrf.mxu0 }
0x1002   : > { %v6081_v16 = vpop.f32.mrf.mxu1  ;;  %v3522_v10 = vpop.f32.mrf.mxu0 }
0x1003   : > { %v3612_v17 = vadd.f32 %v6081_v16, %v6074_v12 }
0x1004   : > { %v3606_v18 = vpop.f32.mrf.mxu1 }
0x1005   : > { %v3607_v19 = vadd.f32 %v3606_v18, %v3522_v10  ;;  %6082 = vmatprep.subr.msk.mxu0 %vm406_vm0, %v3612_v17 }
0x1006   : > { %6083 = vmatpush3.msk.msra.mxu0 %vm406_vm0, %v3612_v17 }
0x1007   : > { %6084 = vmatprep.subr.mxu0 %v3607_v19 }
0x1008   : > { %6085 = vmatpush3.msra.mxu0 %v3607_v19 }
0x1009   : > { %6087 = vmatmul.mubr.msk.f32.vlgmr.msra.gmra.mxu0 %vm1095_vm5, %v6730_v21 }
0x100a   : > { %6098 = vmatprep.mubr.msk.f32.mxu0 %vm1095_vm5, %v6484_v8 }
0x10c9   : > { %v6736_v14 = vpop.f32.mrf.mxu0 }
0x10ca   : > { %v3700_v62 = vmul.f32 0.125, %v6736_v14 }
0x10cb   : > { %v3690_v23 = vpop.f32.mrf.mxu0 }
0x10cc   : > { %v3699_v25 = vmul.f32 0.125, %v3690_v23  ;;  %v3702_v3 = vadd.f32 %v3700_v62, %v6730_v21 }
0x10ce   : > { %v6739_v26 = vadd.f32 %v3699_v25, %v6636_v30 }
0x10d0   : > { %3703 = vxpose.xlu0.b32.start.end [1/1] (short) (narrow) %v6739_v26, 16  ;;  %6089 = vmatprep.subr.mxu1 %v6739_v26 }
0x10d1   : > { %6090 = vmatpush3.msra.mxu1 %v6739_v26 }
0x10fd   : > { %906 = vperm.xlu0 %6220, %v6643_v42  }
0x1101   : > { %863 = vperm.xlu0 %6220, %v825_v28  }
0x1105   : > { %911 = vperm.xlu0 %6220, %v817_v24  }
0x114c   : > { %v3719_v29 = vpop.trf.xlu0 }
0x114d   : > { %6091 = vmatprep.mubr.msk.f32.mxu1 %vm1011_vm4, %v3719_v29 }
0x1150   : > { %v3720_v30 = vpop.trf.xlu0 }
0x1151   : > { %6092 = vmatmul.mubr.msk.f32.vlgmr.msra.gmra.mxu1 %vm1011_vm4, %v3720_v30 }
0x1152   : > { %6105 = vmatprep.mubr.msk.f32.mxu1 %vm1095_vm5, %v6489_v9 }
0x1178   : > { %v907_v36 = vpop.permute.xlu0 %906 }
0x1179   : > { %v920_v37 = vadd.f32 %v907_v36, %v872_v33  ;;  %v5597_v36 = vld [vmem:[%s6904_s8 + $0x28] sm:$0x1f] }
0x117b   : > { %950 = vrot.lane.b32.xlu1 %v920_v37, %s6231_s26  ;;  %v5604_v37 = vld [vmem:[%s6904_s8 + $0x38] sm:$0x1f] }
0x117c   : > { %v864_v42 = vpop.permute.xlu0 %863 }
0x117d   : > { %v873_v39 = vmul.f32 %v864_v42, %v807_v38  ;;  %v5602_v42 = vld [vmem:[%s6905_s9 + $0x28] sm:$0x1f] }
0x1180   : > { %v912_v40 = vpop.permute.xlu0 %911 }
0x1181   : > { %v921_v41 = vadd.f32 %v912_v40, %v873_v39 }
0x1183   : > { %952 = vrot.lane.b32.xlu0 %v921_v41, %s6231_s26 }
0x11ed   : > { %v951_v46 = vpop.permute.xlu1 %950 }
0x11ee   : > { %969 = vst.msk [vmem:[#allocation2 + $0x30] sm:$0xff] %vm962_vm3, %v951_v46 }
0x11f5   : > { %v953_v47 = vpop.permute.xlu0 %952  ;;  %v6759_v48 = vld [vmem:[#allocation2 + $0x30] sm:$0xff] }
0x11f6   : > { %970 = vst.msk [vmem:[#allocation2 + $0x38] sm:$0xff] %vm962_vm3, %v953_v47  ;;  %4248 = vxpose.xlu1.b32.start.end [1/1] (short) (narrow) %v6759_v48, 16 }
0x1211   : > { %v6093_v45 = vpop.f32.mrf.mxu1 }
0x1212   : > { %6094 = vmatprep.subr.msk.mxu0 %vm406_vm0, %v6093_v45  ;;  %6101 = vmatprep.subr.msk.mxu1 %vm406_vm0, %v6093_v45 }
0x1213   : > { %v3807_v55 = vpop.f32.mrf.mxu1  ;;  %6095 = vmatpush3.msk.msra.mxu0 %vm406_vm0, %v6093_v45  ;;  %6102 = vmatpush3.msk.msra.mxu1 %vm406_vm0, %v6093_v45 }
0x1214   : > { %6096 = vmatprep.subr.mxu0 %v3807_v55  ;;  %6103 = vmatprep.subr.mxu1 %v3807_v55 }
0x1215   : > { %6097 = vmatpush3.msra.mxu0 %v3807_v55  ;;  %6104 = vmatpush3.msra.mxu1 %v3807_v55 }
0x1216   : > { %6099 = vmatmul.mubr.msk.f32.vlgmr.msra.gmra.mxu0 %vm1095_vm5, %v5549_v44  ;;  %6106 = vmatmul.mubr.msk.f32.vlgmr.msra.gmra.mxu1 %vm1095_vm5, %v5556_v49 }
0x1217   : > { %6115 = vmatprep.subr.msk.mxu1 %vm406_vm0, %v5554_v50  ;;  %6108 = vmatprep.subr.msk.mxu0 %vm406_vm0, %v5561_v51 }
0x1218   : > { %6116 = vmatpush3.msk.msra.mxu1 %vm406_vm0, %v5554_v50  ;;  %6109 = vmatpush3.msk.msra.mxu0 %vm406_vm0, %v5561_v51 }
0x1219   : > { %6117 = vmatprep.subr.mxu1 %v6524_v20  ;;  %6110 = vmatprep.subr.mxu0 %v6539_v22 }
0x121a   : > { %6118 = vmatpush3.msra.mxu1 %v6524_v20  ;;  %6111 = vmatpush3.msra.mxu0 %v6539_v22 }
0x121b   : > { %6129 = vmatprep.subr.mxu1 %v6759_v48 }
0x1272   : > { %v4264_v52 = vpop.trf.xlu1 }
0x1276   : > { %v4265_v59 = vpop.trf.xlu1 }
0x12d6   : > { %v6100_v53 = vpop.f32.mrf.mxu0  ;;  %v6107_v54 = vpop.f32.mrf.mxu1 }
0x12d8   : > { %v3893_v56 = vpop.f32.mrf.mxu0  ;;  %v3978_v58 = vpop.f32.mrf.mxu1 }
0x12d9   : > { %6112 = vmatprep.mubr.msk.f32.mxu0 %vm1095_vm5, %v3978_v58  ;;  %6119 = vmatprep.mubr.msk.f32.mxu1 %vm1095_vm5, %v3893_v56 }
0x12da   : > { %6113 = vmatmul.mubr.msk.f32.vlgmr.msra.gmra.mxu0 %vm1095_vm5, %v6107_v54  ;;  %6120 = vmatmul.mubr.msk.f32.vlgmr.msra.gmra.mxu1 %vm1095_vm5, %v6100_v53 }
0x12db   : > { %6130 = vmatpush3.msra.mxu1 %v6759_v48  ;;  %6126 = vmatprep.mubr.msk.f32.mxu0 %vm1095_vm5, %v6739_v26 }
0x12dc   : > { %6131 = vmatprep.mubr.msk.f32.mxu1 %vm1011_vm4, %v4264_v52 }
0x12de   : > { %6132 = vmatmul.mubr.msk.f32.vlgmr.msra.gmra.mxu1 %vm1011_vm4, %v4265_v59 }
0x12df   : > { %6145 = vmatprep.mubr.msk.f32.mxu1 %vm1095_vm5, %v6413_v31 }
0x139a   : > { %v6114_v60 = vpop.f32.mrf.mxu0  ;;  %v6121_v61 = vpop.f32.mrf.mxu1 }
0x139b   : > { %v4154_v63 = vadd.f32 %v6121_v61, %v6114_v60 }
0x139c   : > { %v4064_v0 = vpop.f32.mrf.mxu0  ;;  %v4148_v1 = vpop.f32.mrf.mxu1 }
0x139d   : > { %v4149_v57 = vadd.f32 %v4148_v1, %v4064_v0  ;;  %6122 = vmatprep.subr.msk.mxu0 %vm406_vm0, %v4154_v63 }
0x139e   : > { %6123 = vmatpush3.msk.msra.mxu0 %vm406_vm0, %v4154_v63  ;;  %v6133_v2 = vpop.f32.mrf.mxu1 }
0x139f   : > { %6124 = vmatprep.subr.mxu0 %v4149_v57  ;;  %6141 = vmatprep.subr.msk.mxu1 %vm406_vm0, %v6133_v2 }
0x13a0   : > { %6125 = vmatpush3.msra.mxu0 %v4149_v57  ;;  %v4352_v31 = vpop.f32.mrf.mxu1  ;;  %6142 = vmatpush3.msk.msra.mxu1 %vm406_vm0, %v6133_v2 }
0x13a1   : > { %6127 = vmatmul.mubr.msk.f32.vlgmr.msra.gmra.mxu0 %vm1095_vm5, %v3702_v3  ;;  %6134 = vmatprep.subr.msk.mxu0 %vm406_vm0, %v6133_v2 }
0x13a2   : > { %6143 = vmatprep.subr.mxu1 %v4352_v31  ;;  %6135 = vmatpush3.msk.msra.mxu0 %vm406_vm0, %v6133_v2 }
0x13a3   : > { %6144 = vmatpush3.msra.mxu1 %v4352_v31  ;;  %6136 = vmatprep.subr.mxu0 %v4352_v31 }
0x13a4   : > { %6146 = vmatmul.mubr.msk.f32.vlgmr.msra.gmra.mxu1 %vm1095_vm5, %v5579_v4  ;;  %6137 = vmatpush3.msra.mxu0 %v4352_v31 }
0x13a5   : > { %6138 = vmatprep.mubr.msk.f32.mxu0 %vm1095_vm5, %v6396_v27  ;;  %6148 = vmatprep.subr.msk.mxu0 %vm406_vm0, %v5584_v6 }
0x13a6   : > { %6139 = vmatmul.mubr.msk.f32.vlgmr.msra.gmra.mxu0 %vm1095_vm5, %v4362_v5  ;;  %6155 = vmatprep.subr.msk.mxu1 %vm406_vm0, %v4448_v7 }
0x13a7   : > { %6149 = vmatpush3.msk.msra.mxu0 %vm406_vm0, %v5584_v6  ;;  %6156 = vmatpush3.msk.msra.mxu1 %vm406_vm0, %v4448_v7 }
0x13a8   : > { %6150 = vmatprep.subr.mxu0 %v6430_v34  ;;  %6157 = vmatprep.subr.mxu1 %v6438_v35 }
0x13a9   : > { %6151 = vmatpush3.msra.mxu0 %v6430_v34  ;;  %6158 = vmatpush3.msra.mxu1 %v6438_v35 }
0x1461   : > { %v6128_v27 = vpop.f32.mrf.mxu0 }
0x1462   : > { %v4242_v11 = vmul.f32 0.125, %v6128_v27 }
0x1463   : > { %v4232_v13 = vpop.f32.mrf.mxu0 }
0x1464   : > { %v4244_v15 = vadd.f32 %v4242_v11, %v3702_v3  ;;  %v4241_v12 = vmul.f32 0.125, %v4232_v13  ;;  %v6147_v16 = vpop.f32.mrf.mxu1 }
0x1466   : > { %5572 = vst.msk [vmem:[%s6592_s25 + $0x28] sm:$0x1] %vm2072_vm6, %v4244_v15  ;;  %v4243_v17 = vadd.f32 %v4241_v12, %v6739_v26  ;;  %v6140_v10 = vpop.f32.mrf.mxu0  ;;  %v4523_v18 = vpop.f32.mrf.mxu1  ;;  %v978_v26 = vld [vmem:[#allocation2 + $0x38] sm:$0xff] }
0x1467   : > { %6152 = vmatprep.mubr.msk.f32.mxu0 %vm1095_vm5, %v4523_v18 }
0x1468   : > { %5571 = vst.msk [vmem:[%s6592_s25 + $0x20] sm:$0xff] %vm1095_vm5, %v4243_v17  ;;  %v4438_v34 = vpop.f32.mrf.mxu0  ;;  %6153 = vmatmul.mubr.msk.f32.vlgmr.msra.gmra.mxu0 %vm1095_vm5, %v6147_v16 }
0x1469   : > { %6159 = vmatprep.mubr.msk.f32.mxu1 %vm1095_vm5, %v4438_v34  ;;  %6166 = vmatprep.mubr.msk.f32.mxu0 %vm1095_vm5, %v6759_v48 }
0x146a   : > { %6160 = vmatmul.mubr.msk.f32.vlgmr.msra.gmra.mxu1 %vm1095_vm5, %v6140_v10 }
0x1528   : > { %v6154_v35 = vpop.f32.mrf.mxu0 }
0x152a   : > { %v6161_v19 = vpop.f32.mrf.mxu1  ;;  %v4609_v14 = vpop.f32.mrf.mxu0 }
0x152b   : > { %v4699_v21 = vadd.f32 %v6161_v19, %v6154_v35 }
0x152c   : > { %v4693_v23 = vpop.f32.mrf.mxu1 }
0x152d   : > { %v4694_v25 = vadd.f32 %v4693_v23, %v4609_v14  ;;  %6162 = vmatprep.subr.msk.mxu0 %vm406_vm0, %v4699_v21 }
0x152e   : > { %6163 = vmatpush3.msk.msra.mxu0 %vm406_vm0, %v4699_v21 }
0x152f   : > { %6164 = vmatprep.subr.mxu0 %v4694_v25 }
0x1530   : > { %6165 = vmatpush3.msra.mxu0 %v4694_v25 }
0x1531   : > { %6167 = vmatmul.mubr.msk.f32.vlgmr.msra.gmra.mxu0 %vm1095_vm5, %v978_v26 }
0x1532   : > { %6178 = vmatprep.mubr.msk.f32.mxu0 %vm1095_vm5, %v6484_v8 }
0x15f1   : > { %v6168_v24 = vpop.f32.mrf.mxu0 }
0x15f3   : > { %v4777_v28 = vpop.f32.mrf.mxu0 }
0x15f4   : > { %v4786_v29 = vmul.f32 0.125, %v4777_v28 }
0x15f6   : > { %v4788_v30 = vadd.f32 %v4786_v29, %v6759_v48  ;;  %v4787_v48 = vmul.f32 0.125, %v6168_v24 }
0x15f8   : > { %4790 = vxpose.xlu0.b32.start.end [1/1] (short) (narrow) %v4788_v30, 16  ;;  %6169 = vmatprep.subr.mxu1 %v4788_v30  ;;  %v4789_v44 = vadd.f32 %v4787_v48, %v978_v26 }
0x15f9   : > { %6170 = vmatpush3.msra.mxu1 %v4788_v30 }
0x1674   : > { %v4806_v43 = vpop.trf.xlu0 }
0x1675   : > { %6171 = vmatprep.mubr.msk.f32.mxu1 %vm1011_vm4, %v4806_v43 }
0x1678   : > { %v4807_v32 = vpop.trf.xlu0 }
0x1679   : > { %6172 = vmatmul.mubr.msk.f32.vlgmr.msra.gmra.mxu1 %vm1011_vm4, %v4807_v32 }
0x167a   : > { %6185 = vmatprep.mubr.msk.f32.mxu1 %vm1095_vm5, %v6489_v9  ;;  %v5609_v9 = vld [vmem:[%s6905_s9 + $0x38] sm:$0x1f] }
0x1739   : > { %v6173_v33 = vpop.f32.mrf.mxu1 }
0x173a   : > { %6174 = vmatprep.subr.msk.mxu0 %vm406_vm0, %v6173_v33  ;;  %6181 = vmatprep.subr.msk.mxu1 %vm406_vm0, %v6173_v33 }
0x173b   : > { %v4894_v8 = vpop.f32.mrf.mxu1  ;;  %6175 = vmatpush3.msk.msra.mxu0 %vm406_vm0, %v6173_v33  ;;  %6182 = vmatpush3.msk.msra.mxu1 %vm406_vm0, %v6173_v33 }
0x173c   : > { %6176 = vmatprep.subr.mxu0 %v4894_v8  ;;  %6183 = vmatprep.subr.mxu1 %v4894_v8 }
0x173d   : > { %6177 = vmatpush3.msra.mxu0 %v4894_v8  ;;  %6184 = vmatpush3.msra.mxu1 %v4894_v8 }
0x173e   : > { %6179 = vmatmul.mubr.msk.f32.vlgmr.msra.gmra.mxu0 %vm1095_vm5, %v5597_v36  ;;  %6186 = vmatmul.mubr.msk.f32.vlgmr.msra.gmra.mxu1 %vm1095_vm5, %v5604_v37 }
0x173f   : > { %6188 = vmatprep.subr.msk.mxu0 %vm406_vm0, %v5609_v9  ;;  %6195 = vmatprep.subr.msk.mxu1 %vm406_vm0, %v5602_v42 }
0x1740   : > { %6189 = vmatpush3.msk.msra.mxu0 %vm406_vm0, %v5609_v9  ;;  %6196 = vmatpush3.msk.msra.mxu1 %vm406_vm0, %v5602_v42 }
0x1741   : > { %6190 = vmatprep.subr.mxu0 %v6539_v22  ;;  %6197 = vmatprep.subr.mxu1 %v6524_v20 }
0x1742   : > { %6191 = vmatpush3.msra.mxu0 %v6539_v22  ;;  %6198 = vmatpush3.msra.mxu1 %v6524_v20 }
0x17fe   : > { %v6180_v38 = vpop.f32.mrf.mxu0  ;;  %v6187_v39 = vpop.f32.mrf.mxu1 }
0x1800   : > { %v4980_v40 = vpop.f32.mrf.mxu0  ;;  %v5065_v41 = vpop.f32.mrf.mxu1 }
0x1801   : > { %6192 = vmatprep.mubr.msk.f32.mxu0 %vm1095_vm5, %v5065_v41  ;;  %6199 = vmatprep.mubr.msk.f32.mxu1 %vm1095_vm5, %v4980_v40 }
0x1802   : > { %6193 = vmatmul.mubr.msk.f32.vlgmr.msra.gmra.mxu0 %vm1095_vm5, %v6187_v39  ;;  %6200 = vmatmul.mubr.msk.f32.vlgmr.msra.gmra.mxu1 %vm1095_vm5, %v6180_v38 }
0x1803   : > { %6206 = vmatprep.mubr.msk.f32.mxu0 %vm1095_vm5, %v4788_v30 }
0x18c2   : > { %v6194_v46 = vpop.f32.mrf.mxu0  ;;  %v6201_v47 = vpop.f32.mrf.mxu1 }
0x18c3   : > { %v5241_v22 = vadd.f32 %v6201_v47, %v6194_v46 }
0x18c4   : > { %v5151_v20 = vpop.f32.mrf.mxu0  ;;  %v5235_v45 = vpop.f32.mrf.mxu1 }
0x18c5   : > { %v5236_v55 = vadd.f32 %v5235_v45, %v5151_v20  ;;  %6202 = vmatprep.subr.msk.mxu0 %vm406_vm0, %v5241_v22 }
0x18c6   : > { %6203 = vmatpush3.msk.msra.mxu0 %vm406_vm0, %v5241_v22 }
0x18c7   : > { %6204 = vmatprep.subr.mxu0 %v5236_v55 }
0x18c8   : > { %6205 = vmatpush3.msra.mxu0 %v5236_v55 }
0x18c9   : > { %6207 = vmatmul.mubr.msk.f32.vlgmr.msra.gmra.mxu0 %vm1095_vm5, %v4789_v44 }
0x1989   : > { %v6208_v49 = vpop.f32.mrf.mxu0 }
0x198a   : > { %v5329_v50 = vmul.f32 0.125, %v6208_v49 }
0x198b   : > { %v5319_v51 = vpop.f32.mrf.mxu0 }
0x198c   : > { %v5331_v52 = vadd.f32 %v5329_v50, %v4789_v44  ;;  %v5328_v53 = vmul.f32 0.125, %v5319_v51 }
0x198e   : > { %5620 = vst.msk [vmem:[%s6592_s25 + $0x38] sm:$0x1] %vm2072_vm6, %v5331_v52  ;;  %v5330_v54 = vadd.f32 %v5328_v53, %v4788_v30 }
0x1990   : > { %5619 = vst.msk [vmem:[%s6592_s25 + $0x30] sm:$0xff] %vm1095_vm5, %v5330_v54 }
0x1991 PF: > { %s20_s13 = sadd.s32 1, %s6228_s13  }
0x1992   : > { %p17_p5 = scmp.ge.s32.totalorder %s20_s13, 4  }
0x1994   :  { %19 = sbr.rel (!%p17_p5) target bundleno = 1 (0x1), region = 99 }

</bundles_post_ra>
